<compile_context>
chip_gen: v7x
topology: tpu7x:2x2x1
jax: 0.10.0
libtpu: 0.0.40
codegen_flags: <defaults>
</compile_context>

<pallas_src>
import math
from functools import partial

import jax
import jax.numpy as jnp
from jax import lax
from jax.experimental import pallas as pl
from jax.experimental.pallas import tpu as pltpu


def _round_up(v, m):
    return (v + m - 1) // m * m


def arc_margin_kernel(x_ref, w_ref, idx_ref, o_ref, *,
                      cos_m, sin_m, th, mm, scale, easy_margin, c_actual):
    # x_ref: (TM, E) bf16, w_ref: (E, Cp) bf16, idx_ref: (TM, 1) f32,
    # o_ref: (TM, Cp) f32
    # 1x1 conv (no bias) == matmul -> MXU, f32 accumulation
    cosine = jnp.dot(x_ref[...], w_ref[...], preferred_element_type=jnp.float32)

    sine = jnp.sqrt(jnp.clip(1.0 - cosine * cosine, 0.0, 1.0))
    phi = cosine * cos_m - sine * sin_m
    if easy_margin:
        phi = jnp.where(cosine > 0.0, phi, cosine)
    else:
        phi = jnp.where(cosine > th, phi, cosine - mm)

    # torch.argmax(label, 1, keepdim=True): integer index, used arithmetically
    # as a blend factor (exact reference semantics). Pre-reduced in the wrapper.
    one_hot = idx_ref[...]                               # (TM, 1) f32
    out = (one_hot * phi + (1.0 - one_hot) * cosine) * scale

    # Exclude zero-padded class lanes from the softmax.
    if c_actual != out.shape[-1]:
        lane = lax.broadcasted_iota(jnp.int32, out.shape, 1)
        out = jnp.where(lane < c_actual, out, jnp.float32(-1e30))

    # softmax over the class (lane) dimension
    omax = jnp.max(out, axis=-1, keepdims=True)
    e = jnp.exp(out - omax)
    denom = jnp.sum(e, axis=-1, keepdims=True)
    o_ref[...] = (e * pl.reciprocal(denom, approx=True)).astype(o_ref.dtype)


def arc_margin_forward(x_nchw, label_nchw, weight_oihw, *,
                       scale_factor=64.0, margin=0.5, easy_margin=False,
                       tm=256):
    """x_nchw: (N, emb_size, H, W); label_nchw: (N, K, H, W);
    weight_oihw: effective (weight-normed) conv weight (C, emb_size, 1, 1)."""
    N, E, H, W = x_nchw.shape
    C = weight_oihw.shape[0]
    K = label_nchw.shape[1]
    P = N * H * W

    # --- layout plumbing: NCHW -> channels-last flattened rows ----------------
    # TODO(synk): if the caller can supply / consume channels-last, these
    # transposes (full-tensor XLA copies) can be dropped entirely.
    x2 = jnp.transpose(x_nchw, (0, 2, 3, 1)).reshape(P, E)
    l2 = jnp.transpose(label_nchw, (0, 2, 3, 1)).reshape(P, K)
    w2 = weight_oihw.reshape(C, E).T                      # (E, C)

    # Pre-reduce the label to its argmax index (first occurrence), as f32.
    idx = jnp.argmax(l2, axis=-1, keepdims=True).astype(jnp.float32)  # (P, 1)

    # bf16 matmul operands (MXU native); everything else stays f32.
    x2 = x2.astype(jnp.bfloat16)
    w2 = w2.astype(jnp.bfloat16)

    # Pad rows to a multiple of tm and classes to a multiple of 128 so output
    # stores are lane-dense and BlockSpec tiling constraints are met.
    Pp = _round_up(P, tm)
    Cp = _round_up(C, 128)
    if Pp != P:
        x2 = jnp.pad(x2, ((0, Pp - P), (0, 0)))
        idx = jnp.pad(idx, ((0, Pp - P), (0, 0)))
    if Cp != C:
        w2 = jnp.pad(w2, ((0, 0), (0, Cp - C)))

    cos_m = math.cos(margin)
    sin_m = math.sin(margin)
    th = math.cos(math.pi - margin)
    mm = math.sin(math.pi - margin) * margin

    kernel = partial(arc_margin_kernel, cos_m=cos_m, sin_m=sin_m, th=th, mm=mm,
                     scale=scale_factor, easy_margin=easy_margin, c_actual=C)

    out2 = pl.pallas_call(
        kernel,
        out_shape=jax.ShapeDtypeStruct((Pp, Cp), jnp.float32),
        grid_spec=pltpu.PrefetchScalarGridSpec(
            num_scalar_prefetch=0,
            grid=(Pp // tm,),
            in_specs=[pl.BlockSpec((tm, E), lambda i: (i, 0)),    # x rows (bf16)
                      pl.BlockSpec((E, Cp), lambda i: (0, 0)),    # weight (resident, bf16)
                      pl.BlockSpec((tm, 1), lambda i: (i, 0))],   # argmax blend factor
            out_specs=pl.BlockSpec((tm, Cp), lambda i: (i, 0))),
        compiler_params=pltpu.CompilerParams(
            dimension_semantics=("parallel",)),
    )(x2, w2, idx)

    # Drop padding, back to NCHW.
    out2 = out2[:P, :C]
    return jnp.transpose(out2.reshape(N, H, W, C), (0, 3, 1, 2))


if __name__ == "__main__":
    key = jax.random.PRNGKey(0)
    k1, k2, k3 = jax.random.split(key, 3)

    # small shapes consistent with the module (P = N*H*W = 512 -> 2 grid steps)
    N, H, W = 2, 16, 16
    emb_size = 32
    id_num = 15
    C = id_num + 1  # conv out channels

    x = jax.random.normal(k1, (N, emb_size, H, W), jnp.float32)
    label = jax.random.normal(k2, (N, C, H, W), jnp.float32)

    # deterministic parameter init: xavier_uniform for Conv2d(emb_size, C, 1)
    fan_in, fan_out = emb_size, C
    bound = math.sqrt(6.0 / (fan_in + fan_out))
    v = jax.random.uniform(k3, (C, emb_size, 1, 1), jnp.float32, -bound, bound)
    # weight_norm (dim=0): g initialized to ||v|| per out-channel
    vnorm = jnp.sqrt(jnp.sum(v * v, axis=(1, 2, 3), keepdims=True))
    w_eff = vnorm * v / vnorm  # effective weight == v at init

    out = arc_margin_forward(x, label, w_eff,
                             scale_factor=64.0, margin=0.5, easy_margin=False,
                             tm=256)
    jax.block_until_ready(out)

    assert out.shape == (N, C, H, W)
    assert bool(jnp.all(jnp.isfinite(out)))
    # softmax rows should sum to ~1 (approx reciprocal -> loose tolerance)
    row_sums = jnp.sum(out, axis=1)
    assert bool(jnp.all(jnp.abs(row_sums - 1.0) < 1e-2))
    print("KERNEL_OK")
</pallas_src>

<mosaic_0001>
module attributes {stable_mosaic.version = 11 : i64} {
  func.func @arc_margin_kernel(%arg0: i32, %arg1: memref<256x32xbf16, #tpu.memory_space<vmem>>, %arg2: memref<32x128xbf16, #tpu.memory_space<vmem>>, %arg3: memref<256x1xf32, #tpu.memory_space<vmem>>, %arg4: memref<256x128xf32, #tpu.memory_space<vmem>>) attributes {dimension_semantics = [#tpu.dimension_semantics<parallel>], iteration_bounds = array<i64: 2>, scalar_prefetch = 0 : i64, scratch_operands = 0 : i64, tpu.core_type = #tpu.core_type<tc>, window_params = [{transform_indices = @transform_0, window_bounds = array<i64: 256, 32>}, {pipeline_mode = #tpu.pipeline_mode<synchronous>, transform_indices = @transform_1, window_bounds = array<i64: 32, 128>}, {transform_indices = @transform_2, window_bounds = array<i64: 256, 1>}, {transform_indices = @transform_3, window_bounds = array<i64: 256, 128>}]} {
    %c0 = arith.constant 0 : index
    %c0_0 = arith.constant 0 : index
    %0 = vector.load %arg1[%c0, %c0_0] : memref<256x32xbf16, #tpu.memory_space<vmem>>, vector<256x32xbf16>
    %c0_1 = arith.constant 0 : index
    %c0_2 = arith.constant 0 : index
    %1 = vector.load %arg2[%c0_1, %c0_2] : memref<32x128xbf16, #tpu.memory_space<vmem>>, vector<32x128xbf16>
    %cst = arith.constant dense<0.000000e+00> : vector<256x128xf32>
    %2 = tpu.matmul %0, %1, %cst {dimension_numbers = #tpu.dot_dimension_numbers<[1], [0], [0], [1], [0, 0, 1, 1], [], []>} : vector<256x32xbf16>, vector<32x128xbf16>, vector<256x128xf32> -> vector<256x128xf32>
    %3 = arith.mulf %2, %2 : vector<256x128xf32>
    %cst_3 = arith.constant 1.000000e+00 : f32
    %4 = vector.broadcast %cst_3 : f32 to vector<256x128xf32>
    %5 = arith.subf %4, %3 : vector<256x128xf32>
    %cst_4 = arith.constant 0.000000e+00 : f32
    %cst_5 = arith.constant 1.000000e+00 : f32
    %6 = vector.broadcast %cst_4 : f32 to vector<256x128xf32>
    %7 = arith.maximumf %6, %5 : vector<256x128xf32>
    %8 = vector.broadcast %cst_5 : f32 to vector<256x128xf32>
    %9 = arith.minimumf %8, %7 : vector<256x128xf32>
    %10 = math.sqrt %9 : vector<256x128xf32>
    %cst_6 = arith.constant 0.87758255 : f32
    %11 = vector.broadcast %cst_6 : f32 to vector<256x128xf32>
    %12 = arith.mulf %2, %11 : vector<256x128xf32>
    %cst_7 = arith.constant 0.47942555 : f32
    %13 = vector.broadcast %cst_7 : f32 to vector<256x128xf32>
    %14 = arith.mulf %10, %13 : vector<256x128xf32>
    %15 = arith.subf %12, %14 : vector<256x128xf32>
    %cst_8 = arith.constant -0.87758255 : f32
    %16 = vector.broadcast %cst_8 : f32 to vector<256x128xf32>
    %17 = arith.cmpf ogt, %2, %16 : vector<256x128xf32>
    %cst_9 = arith.constant 0.239712775 : f32
    %18 = vector.broadcast %cst_9 : f32 to vector<256x128xf32>
    %19 = arith.subf %2, %18 : vector<256x128xf32>
    %20 = arith.select %17, %15, %19 : vector<256x128xi1>, vector<256x128xf32>
    %c0_10 = arith.constant 0 : index
    %c0_11 = arith.constant 0 : index
    %21 = vector.load %arg3[%c0_10, %c0_11] : memref<256x1xf32, #tpu.memory_space<vmem>>, vector<256x1xf32>
    %22 = vector.broadcast %21 : vector<256x1xf32> to vector<256x128xf32>
    %23 = arith.mulf %22, %20 : vector<256x128xf32>
    %cst_12 = arith.constant 1.000000e+00 : f32
    %24 = vector.broadcast %cst_12 : f32 to vector<256x1xf32>
    %25 = arith.subf %24, %21 : vector<256x1xf32>
    %26 = vector.broadcast %25 : vector<256x1xf32> to vector<256x128xf32>
    %27 = arith.mulf %26, %2 : vector<256x128xf32>
    %28 = arith.addf %23, %27 : vector<256x128xf32>
    %cst_13 = arith.constant 6.400000e+01 : f32
    %29 = vector.broadcast %cst_13 : f32 to vector<256x128xf32>
    %30 = arith.mulf %28, %29 : vector<256x128xf32>
    %31 = tpu.iota {dimensions = array<i32: 1>} : vector<256x128xi32>
    %c16_i32 = arith.constant 16 : i32
    %32 = vector.broadcast %c16_i32 : i32 to vector<256x128xi32>
    %33 = arith.cmpi slt, %31, %32 : vector<256x128xi32>
    %cst_14 = arith.constant -1.000000e+30 : f32
    %34 = vector.broadcast %cst_14 : f32 to vector<256x128xf32>
    %35 = arith.select %33, %30, %34 : vector<256x128xi1>, vector<256x128xf32>
    %cst_15 = arith.constant dense<0xFF800000> : vector<256xf32>
    %36 = vector.multi_reduction <maximumf>, %35, %cst_15 [1] : vector<256x128xf32> to vector<256xf32>
    %37 = vector.shape_cast %36 : vector<256xf32> to vector<256x1xf32>
    %38 = vector.broadcast %37 : vector<256x1xf32> to vector<256x128xf32>
    %39 = arith.subf %35, %38 : vector<256x128xf32>
    %40 = math.exp %39 : vector<256x128xf32>
    %cst_16 = arith.constant dense<0.000000e+00> : vector<256xf32>
    %41 = vector.multi_reduction <add>, %40, %cst_16 [1] : vector<256x128xf32> to vector<256xf32>
    %42 = vector.shape_cast %41 : vector<256xf32> to vector<256x1xf32>
    %43 = tpu.reciprocal %42 {approx = true} : vector<256x1xf32> -> vector<256x1xf32>
    %44 = vector.broadcast %43 : vector<256x1xf32> to vector<256x128xf32>
    %45 = arith.mulf %40, %44 : vector<256x128xf32>
    %c0_17 = arith.constant 0 : index
    %c0_18 = arith.constant 0 : index
    %46 = vector.load %arg4[%c0_17, %c0_18] : memref<256x128xf32, #tpu.memory_space<vmem>>, vector<256x128xf32>
    tpu.vector_store %arg4[%c0_17, %c0_18], %45 {strides = array<i32>} : memref<256x128xf32, #tpu.memory_space<vmem>>, vector<256x128xf32>,
    return
  }
  func.func @transform_0(%arg0: i32) -> (i32, i32) {
    %c0_i32 = arith.constant 0 : i32
    %c0_i32_0 = arith.constant 0 : i32
    return %arg0, %c0_i32 : i32, i32
  }
  func.func @transform_1(%arg0: i32) -> (i32, i32) {
    %c0_i32 = arith.constant 0 : i32
    %c0_i32_0 = arith.constant 0 : i32
    %c0_i32_1 = arith.constant 0 : i32
    return %c0_i32, %c0_i32_0 : i32, i32
  }
  func.func @transform_2(%arg0: i32) -> (i32, i32) {
    %c0_i32 = arith.constant 0 : i32
    %c0_i32_0 = arith.constant 0 : i32
    return %arg0, %c0_i32 : i32, i32
  }
  func.func @transform_3(%arg0: i32) -> (i32, i32) {
    %c0_i32 = arith.constant 0 : i32
    %c0_i32_0 = arith.constant 0 : i32
    return %arg0, %c0_i32 : i32, i32
  }
}

</mosaic_0001>

<bundles_post_ra>
// kernel: tpu_custom_call.1
= control target key start
LH: loop header
LB: loop body
LE: loop exit
PB: predicated region body
PF: predicated region fallthrough
CT: control target
= control target key end

     0   :  { %8 = vsyncpa [#allocation3], 0  ;;  %s4193_s0 = inlined_call_operand.vmem [shape: bf16[512,32], index: 0, kind: input, shape index: {}]   ;;  %s4194_s1 = inlined_call_operand.vmem [shape: bf16[32,128], index: 1, kind: input, shape index: {}]   ;;  %s4195_s2 = inlined_call_operand.vmem [shape: f32[512,1], index: 2, kind: input, shape index: {}]   ;;  %s4196_s3 = inlined_call_operand.hbm [shape: f32[512,128], index: 3, kind: output, shape index: {}]  }
   0x1   :  { %10 = vsyncpa [#allocation3 + $0x1], 0  ;;  %s2513_s12 = smov 0   ;;  %s2515_s13 = smov 0  }
   0x2   :  { %s2517_s14 = smov 0   ;;  %s2519_s15 = smov 0  }
   0x3 LB: > { %s2534_s16 = sadd.s32 4294967295, %s2487_s15   ;;  %s2032_s17 = sadd.s32 4294967294, %s2487_s15   ;;  %s2487_s15 = sphi %s2519_s15, %s4479_s15   ;;  %s2483_s14 = sphi %s2517_s14, %s4478_s14   ;;  %s2479_s13 = sphi %s2515_s13, %s4477_s13   ;;  %s2475_s12 = sphi %s2513_s12, %s4476_s12  }
   0x4   : > { %s2538_s18 = sadd.s32 1, %s2487_s15   ;;  %s96_s19 = sadd.s32 1, %s2483_s14 }
   0x5   : > { %s93_s20 = ssub.s32 %s2487_s15, %s2538_s18  ;;  %p106_p0 = scmp.ne.s32.totalorder %s2483_s14, %s2479_s13 }
   0x6   : > { %p94_p1 = scmp.eq.s32.totalorder %s93_s20, 0  ;;  %p107_p2 = scmp.eq.s32.totalorder %s2534_s16, 1 }
   0x7   : > { %p112_p3 = scmp.ne.s32.totalorder %s2479_s13, %s2475_s12  ;;  %p113_p4 = scmp.eq.s32.totalorder %s2032_s17, 1 }
   0x8   : > { %s2549_s21 = scalar_select %p94_p1, %s2483_s14, %s96_s19  }
   0x9   : > { %p2551_p5 = por %p107_p2, %p106_p0  ;;  %p2555_p6 = por %p113_p4, %p112_p3 }
   0xa   : > { %p2035_p7 = scmp.ge.s32.totalorder %s2487_s15, 1  ;;  %p152_p8 = scmp.lt.s32.totalorder %s2487_s15, 3 }
   0xc   : > { %p153_p9 = pnand %p2035_p7, %p152_p8 }
   0xe   : > { %156 = sbr.rel (%p153_p9) target bundleno = 764 (0x2fc), region = 32 }
  0x15   : > { %v2215_v0 = vld [vmem:[%s4194_s1] sm:$0xff]   ;;  %v2489_v1 = vmov 0   ;;  %v2216_v2 = vld [vmem:[%s4194_s1 + $0x8] sm:$0xff]   ;;  %s2037_s28 = sshll.u32 %s2534_s16, 5  ;;  %vm323_vm0 = vcmask 261120   ;;  %s178_s10 = sand.u32 1, %s2479_s13  }
  0x16   : > { %2214 = vset.pattern.permute.xlu1 %v2489_v1  ;;  %2213 = vset.pattern.permute.xlu0 %v2489_v1  ;;  %p182_p10 = scmp.lt.s32.totalorder %s2037_s28, 63  ;;  %s2036_s11 = sshll.u32 %s178_s10, 8 }
  0x17   : > { %2131 = vmatprep.subr.bf16.mxu0 %v2215_v0  ;;  %2167 = vmatprep.subr.bf16.mxu1 %v2215_v0  ;;  %s4076_s17 = scalar_lea.vmem [#allocation2], %s2036_s11  ;;  %s2112_s19 = sshll.u32 %s2534_s16, 12 }
  0x18   : > { %2132 = vmatpush3.bf16.msra.mxu0 %v2215_v0  ;;  %2169 = vmatpush3.bf16.msra.mxu1 %v2215_v0  ;;  %s4481_s28 = smov (!%p182_p10, %s2037_s28), 63  ;;  %s1958_s20 = sshll.u32 %s4076_s17, 4  ;;  %s4146_s20 = int_to_ptr.vmem [resolvable:$true] %s1958_s20 }
  0x19   : > { %2133 = vmatprep.subr.bf16.mxu0 %v2216_v2  ;;  %2168 = vmatprep.subr.bf16.mxu1 %v2216_v2  ;;  %s2040_s29 = sshll.u32 %s4481_s28, 3  ;;  %s2038_s30 = sshll.u32 %s4481_s28, 2 }
  0x1a   : > { %s2571_s6 = scalar_lea.vmem %s4195_s2, %s2040_s29  ;;  %s2576_s9 = scalar_lea.vmem %s4193_s0, %s2038_s30 }
  0x1b   : > { %v2579_v3 = vld [vmem:[%s2571_s6 + $0x10] sm:$0xff]  ;;  %v2582_v4 = vld [vmem:[%s2571_s6] sm:$0xff]  ;;  %v2219_v7 = vld [vmem:[%s2576_s9 + $0x8] sm:$0xff]   ;;  %s4144_s26 = scalar_lea.hbm %s4196_s3, %s2112_s19  ;;  %s4152_s27 = scalar_lea.sflag [#allocation3], %s178_s10 }
  0x1c   : > { %2134 = vmatpush3.bf16.msra.mxu0 %v2216_v2  ;;  %2170 = vmatpush3.bf16.msra.mxu1 %v2216_v2  ;;  %v2217_v5 = vld [vmem:[%s2576_s9] sm:$0xff]   ;;  %v2220_v8 = vld [vmem:[%s2576_s9 + $0x48] sm:$0xff]   ;;  %v2593_v9 = vld [vmem:[%s2571_s6 + $0x18] sm:$0xff]  ;;  %v1301_v52 = vsub.f32 1.0, %v2582_v4  ;;  %v1303_v54 = vsub.f32 1.0, %v2579_v3  ;;  %s2425_s16 = scalar_lea.vmem %s4146_s20, 4096 }
  0x1d   : > { %1121 = vperm.xlu1 %2214, %v2579_v3   ;;  %1111 = vperm.xlu0 %2213, %v2582_v4   ;;  %v2218_v6 = vld [vmem:[%s2576_s9 + $0x40] sm:$0xff]   ;;  %v2598_v10 = vld [vmem:[%s2571_s6 + $0x8] sm:$0xff]  ;;  %v2221_v13 = vld [vmem:[%s2576_s9 + $0x10] sm:$0xff]   ;;  %v1304_v53 = vsub.f32 1.0, %v2593_v9  ;;  %p2426_p11 = scmp.ne.s32.totalorder %s4146_s20, %s2425_s16  ;;  %s2490_s28 = smov [#allocation2]  }
  0x1e   : > { %2135 = vmatprep.mubr.msk.bf16.mxu0 %vm323_vm0, %v2217_v5  ;;  %2151 = vmatprep.mubr.msk.bf16.mxu1 %vm323_vm0, %v2218_v6  ;;  %v2601_v11 = vld [vmem:[%s2571_s6 + $0x28] sm:$0xff]  ;;  %v2606_v12 = vld [vmem:[%s2571_s6 + $0x20] sm:$0xff]  ;;  %v2222_v14 = vld [vmem:[%s2576_s9 + $0x50] sm:$0xff]   ;;  %v1302_v51 = vsub.f32 1.0, %v2598_v10  ;;  %s2429_s29 = sshll.u32 %s2490_s28, 4  ;;  %s2430_s29 = int_to_ptr.vmem [resolvable:$false] %s2429_s29 }
  0x1f   : > { %2136 = vmatmul.mubr.msk.bf16.vlgmr.msra.gmra.mrb[0].mxu0 %vm323_vm0, %v2219_v7  ;;  %2152 = vmatmul.mubr.msk.bf16.vlgmr.msra.gmra.mrb[0].mxu1 %vm323_vm0, %v2220_v8  ;;  %v2223_v15 = vld [vmem:[%s2576_s9 + $0x18] sm:$0xff]   ;;  %v2620_v18 = vld [vmem:[%s2571_s6 + $0x30] sm:$0xff]  ;;  %v2225_v19 = vld [vmem:[%s2576_s9 + $0x20] sm:$0xff]   ;;  %v1306_v55 = vsub.f32 1.0, %v2601_v11  ;;  %v1305_v56 = vsub.f32 1.0, %v2606_v12  ;;  %p2427_p12 = pnand %p2426_p11, %p2551_p5  ;;  %s2431_s30 = scalar_lea.vmem %s2430_s29, 8192 }
  0x20   : > { %2139 = vmatprep.mubr.msk.bf16.mxu0 %vm323_vm0, %v2221_v13  ;;  %2155 = vmatprep.mubr.msk.bf16.mxu1 %vm323_vm0, %v2222_v14  ;;  %v2224_v16 = vld [vmem:[%s2576_s9 + $0x58] sm:$0xff]   ;;  %v2226_v20 = vld [vmem:[%s2576_s9 + $0x60] sm:$0xff]   ;;  %v2629_v21 = vld [vmem:[%s2571_s6 + $0x48] sm:$0xff]  ;;  %v1307_v58 = vsub.f32 1.0, %v2620_v18  ;;  %p2432_p0 = scmp.lt.s32.totalorder %s4146_s20, %s2430_s29  ;;  %p2433_p1 = scmp.lt.s32.totalorder %s2431_s30, %s2425_s16 }
  0x21   : > { %1126 = vperm.xlu1 %2214, %v2593_v9   ;;  %1116 = vperm.xlu0 %2213, %v2598_v10   ;;  %v2617_v17 = vld [vmem:[%s2571_s6 + $0x38] sm:$0xff]  ;;  %v2632_v22 = vld [vmem:[%s2571_s6 + $0x40] sm:$0xff]  ;;  %v2227_v23 = vld [vmem:[%s2576_s9 + $0x28] sm:$0xff]   ;;  %v1310_v59 = vsub.f32 1.0, %v2629_v21  ;;  %p2428_p13 = pneg %p2427_p12 }
  0x22   : > { %v2228_v24 = vld [vmem:[%s2576_s9 + $0x68] sm:$0xff]   ;;  %v2639_v25 = vld [vmem:[%s2571_s6 + $0x58] sm:$0xff]  ;;  %v2643_v26 = vld [vmem:[%s2571_s6 + $0x50] sm:$0xff]  ;;  %v1308_v57 = vsub.f32 1.0, %v2617_v17  ;;  %v1309_v60 = vsub.f32 1.0, %v2632_v22  ;;  %p2434_p2 = por %p2433_p1, %p2432_p0 }
  0x23   : > { %v2229_v27 = vld [vmem:[%s2576_s9 + $0x30] sm:$0xff]   ;;  %v2653_v29 = vld [vmem:[%s2571_s6 + $0x68] sm:$0xff]  ;;  %v2656_v30 = vld [vmem:[%s2571_s6 + $0x60] sm:$0xff]  ;;  %v1312_v61 = vsub.f32 1.0, %v2639_v25  ;;  %v1311_v62 = vsub.f32 1.0, %v2643_v26 }
  0x24   : > { %v2230_v28 = vld [vmem:[%s2576_s9 + $0x70] sm:$0xff]   ;;  %v2231_v31 = vld [vmem:[%s2576_s9 + $0x38] sm:$0xff]   ;;  %v2675_v35 = vld [vmem:[%s2571_s6 + $0x88] sm:$0xff]  ;;  %v1314_v63 = vsub.f32 1.0, %v2653_v29  ;;  %v1313_v0 = vsub.f32 1.0, %v2656_v30  ;;  %p2435_p3 = pnand %p2434_p2, %p2428_p13 }
  0x25   : > { %1136 = vperm.xlu1 %2214, %v2601_v11   ;;  %1131 = vperm.xlu0 %2213, %v2606_v12   ;;  %v2232_v32 = vld [vmem:[%s2576_s9 + $0x78] sm:$0xff]   ;;  %v2668_v34 = vld [vmem:[%s2571_s6 + $0x70] sm:$0xff]  ;;  %v2678_v36 = vld [vmem:[%s2571_s6 + $0x80] sm:$0xff]  ;;  %v1318_v3 = vsub.f32 1.0, %v2675_v35 }
  0x26   : > { %v2665_v33 = vld [vmem:[%s2571_s6 + $0x78] sm:$0xff]  ;;  %v2686_v38 = vld [vmem:[%s2571_s6 + $0x90] sm:$0xff]  ;;  %v2691_v39 = vld [vmem:[%s2571_s6 + $0xa8] sm:$0xff]  ;;  %v1315_v2 = vsub.f32 1.0, %v2668_v34  ;;  %v1317_v4 = vsub.f32 1.0, %v2678_v36 }
  0x27   : > { %2140 = vmatmul.mubr.msk.bf16.gmra.mrb[4].mxu0 %vm323_vm0, %v2223_v15  ;;  %2156 = vmatmul.mubr.msk.bf16.gmra.mrb[4].mxu1 %vm323_vm0, %v2224_v16  ;;  %v2683_v37 = vld [vmem:[%s2571_s6 + $0x98] sm:$0xff]  ;;  %v2694_v40 = vld [vmem:[%s2571_s6 + $0xa0] sm:$0xff]  ;;  %v2702_v42 = vld [vmem:[%s2571_s6 + $0xb0] sm:$0xff]  ;;  %v1316_v1 = vsub.f32 1.0, %v2665_v33  ;;  %v1319_v6 = vsub.f32 1.0, %v2686_v38  ;;  %v1322_v7 = vsub.f32 1.0, %v2691_v39 }
  0x28   : > { %2143 = vmatprep.mubr.msk.bf16.mxu0 %vm323_vm0, %v2225_v19  ;;  %2159 = vmatprep.mubr.msk.bf16.mxu1 %vm323_vm0, %v2226_v20  ;;  %v2699_v41 = vld [vmem:[%s2571_s6 + $0xb8] sm:$0xff]  ;;  %v2707_v43 = vld [vmem:[%s2571_s6 + $0xc8] sm:$0xff]  ;;  %v2710_v44 = vld [vmem:[%s2571_s6 + $0xc0] sm:$0xff]  ;;  %v1320_v5 = vsub.f32 1.0, %v2683_v37  ;;  %v1321_v8 = vsub.f32 1.0, %v2694_v40  ;;  %v1323_v10 = vsub.f32 1.0, %v2702_v42 }
  0x29   : > { %1146 = vperm.xlu1 %2214, %v2617_v17   ;;  %1141 = vperm.xlu0 %2213, %v2620_v18   ;;  %v2715_v45 = vld [vmem:[%s2571_s6 + $0xd8] sm:$0xff]  ;;  %v2718_v46 = vld [vmem:[%s2571_s6 + $0xd0] sm:$0xff]  ;;  %v2723_v47 = vld [vmem:[%s2571_s6 + $0xe8] sm:$0xff]  ;;  %v1324_v9 = vsub.f32 1.0, %v2699_v41  ;;  %v1326_v11 = vsub.f32 1.0, %v2707_v43  ;;  %v1325_v12 = vsub.f32 1.0, %v2710_v44 }
  0x2a   : > { %v2726_v48 = vld [vmem:[%s2571_s6 + $0xe0] sm:$0xff]  ;;  %v2731_v49 = vld [vmem:[%s2571_s6 + $0xf8] sm:$0xff]  ;;  %v2734_v50 = vld [vmem:[%s2571_s6 + $0xf0] sm:$0xff]  ;;  %v1328_v13 = vsub.f32 1.0, %v2715_v45  ;;  %v1327_v14 = vsub.f32 1.0, %v2718_v46  ;;  %v1330_v15 = vsub.f32 1.0, %v2723_v47 }
  0x2b   : > { %v1329_v16 = vsub.f32 1.0, %v2726_v48  ;;  %v1332_v17 = vsub.f32 1.0, %v2731_v49  ;;  %v1331_v18 = vsub.f32 1.0, %v2734_v50 }
  0x2d   : > { %1156 = vperm.xlu1 %2214, %v2629_v21   ;;  %1151 = vperm.xlu0 %2213, %v2632_v22  }
  0x2f   : > { %2144 = vmatmul.mubr.msk.bf16.gmra.mrb[8].mxu0 %vm323_vm0, %v2227_v23  ;;  %2160 = vmatmul.mubr.msk.bf16.gmra.mrb[8].mxu1 %vm323_vm0, %v2228_v24 }
  0x30   : > { %2147 = vmatprep.mubr.msk.bf16.mxu0 %vm323_vm0, %v2229_v27  ;;  %2163 = vmatprep.mubr.msk.bf16.mxu1 %vm323_vm0, %v2230_v28 }
  0x31   : > { %1166 = vperm.xlu1 %2214, %v2639_v25   ;;  %1161 = vperm.xlu0 %2213, %v2643_v26  }
  0x35   : > { %1176 = vperm.xlu1 %2214, %v2653_v29   ;;  %1171 = vperm.xlu0 %2213, %v2656_v30  }
  0x37   : > { %2148 = vmatmul.mubr.msk.bf16.gmra.mrb[12].mxu0 %vm323_vm0, %v2231_v31  ;;  %2164 = vmatmul.mubr.msk.bf16.gmra.mrb[12].mxu1 %vm323_vm0, %v2232_v32 }
  0x39   : > { %1186 = vperm.xlu1 %2214, %v2665_v33   ;;  %1181 = vperm.xlu0 %2213, %v2668_v34  }
  0x3d   : > { %1196 = vperm.xlu1 %2214, %v2675_v35   ;;  %1191 = vperm.xlu0 %2213, %v2678_v36  }
  0x41   : > { %1206 = vperm.xlu1 %2214, %v2683_v37   ;;  %1201 = vperm.xlu0 %2213, %v2686_v38  }
  0x45   : > { %1216 = vperm.xlu1 %2214, %v2691_v39   ;;  %1211 = vperm.xlu0 %2213, %v2694_v40  }
  0x49   : > { %1226 = vperm.xlu1 %2214, %v2699_v41   ;;  %1221 = vperm.xlu0 %2213, %v2702_v42  }
  0x4d   : > { %1236 = vperm.xlu1 %2214, %v2707_v43   ;;  %1231 = vperm.xlu0 %2213, %v2710_v44  }
  0x51   : > { %1246 = vperm.xlu1 %2214, %v2715_v45   ;;  %1241 = vperm.xlu0 %2213, %v2718_v46  }
  0x55   : > { %1256 = vperm.xlu1 %2214, %v2723_v47   ;;  %1251 = vperm.xlu0 %2213, %v2726_v48  }
  0x59   : > { %1266 = vperm.xlu1 %2214, %v2731_v49   ;;  %1261 = vperm.xlu0 %2213, %v2734_v50  }
  0x5d   : > { %1340 = vperm.xlu1 %2214, %v1302_v51   ;;  %1335 = vperm.xlu0 %2213, %v1301_v52  }
  0x61   : > { %1350 = vperm.xlu1 %2214, %v1304_v53   ;;  %1345 = vperm.xlu0 %2213, %v1303_v54  }
  0x65   : > { %1360 = vperm.xlu1 %2214, %v1306_v55   ;;  %1355 = vperm.xlu0 %2213, %v1305_v56  }
  0x69   : > { %1370 = vperm.xlu1 %2214, %v1308_v57   ;;  %1365 = vperm.xlu0 %2213, %v1307_v58  }
  0x6d   : > { %1380 = vperm.xlu1 %2214, %v1310_v59   ;;  %1375 = vperm.xlu0 %2213, %v1309_v60  }
  0x71   : > { %1390 = vperm.xlu1 %2214, %v1312_v61   ;;  %1385 = vperm.xlu0 %2213, %v1311_v62  }
  0x75   : > { %1400 = vperm.xlu1 %2214, %v1314_v63   ;;  %1395 = vperm.xlu0 %2213, %v1313_v0  }
  0x79   : > { %1410 = vperm.xlu1 %2214, %v1316_v1   ;;  %1405 = vperm.xlu0 %2213, %v1315_v2  }
  0x7d   : > { %1420 = vperm.xlu1 %2214, %v1318_v3   ;;  %1415 = vperm.xlu0 %2213, %v1317_v4  }
  0x81   : > { %1430 = vperm.xlu1 %2214, %v1320_v5   ;;  %1425 = vperm.xlu0 %2213, %v1319_v6  }
  0x85   : > { %1440 = vperm.xlu1 %2214, %v1322_v7   ;;  %1435 = vperm.xlu0 %2213, %v1321_v8  }
  0x89   : > { %1450 = vperm.xlu1 %2214, %v1324_v9   ;;  %1445 = vperm.xlu0 %2213, %v1323_v10  }
  0x8d   : > { %1460 = vperm.xlu1 %2214, %v1326_v11   ;;  %1455 = vperm.xlu0 %2213, %v1325_v12  }
  0x91   : > { %1470 = vperm.xlu1 %2214, %v1328_v13   ;;  %1465 = vperm.xlu0 %2213, %v1327_v14  }
  0x95   : > { %1480 = vperm.xlu1 %2214, %v1330_v15   ;;  %1475 = vperm.xlu0 %2213, %v1329_v16  }
  0x99   : > { %1490 = vperm.xlu1 %2214, %v1332_v17   ;;  %1485 = vperm.xlu0 %2213, %v1331_v18  }
  0x9c   : > { %v2770_v19 = vpop.permute.xlu1 %1121  ;;  %v2772_v20 = vpop.permute.xlu0 %1111 }
  0x9d   : > { %4249 = vst [vmem:[#allocation5_spill] sm:$0xff] %v2770_v19  ;;  %4250 = vst [vmem:[#allocation6_spill] sm:$0xff] %v2772_v20 }
  0xa0   : > { %v2774_v21 = vpop.permute.xlu1 %1126  ;;  %v2776_v22 = vpop.permute.xlu0 %1116 }
  0xa1   : > { %4251 = vst [vmem:[#allocation7_spill] sm:$0xff] %v2774_v21  ;;  %4252 = vst [vmem:[#allocation8_spill] sm:$0xff] %v2776_v22 }
  0xa4   : > { %v2778_v23 = vpop.permute.xlu1 %1136  ;;  %v2780_v24 = vpop.permute.xlu0 %1131 }
  0xa5   : > { %4253 = vst [vmem:[#allocation9_spill] sm:$0xff] %v2778_v23  ;;  %4254 = vst [vmem:[#allocation10_spill] sm:$0xff] %v2780_v24 }
  0xa8   : > { %v2782_v25 = vpop.permute.xlu1 %1146  ;;  %v2784_v26 = vpop.permute.xlu0 %1141 }
  0xa9   : > { %4255 = vst [vmem:[#allocation11_spill] sm:$0xff] %v2782_v25  ;;  %4256 = vst [vmem:[#allocation12_spill] sm:$0xff] %v2784_v26 }
  0xac   : > { %v2786_v27 = vpop.permute.xlu1 %1156  ;;  %v2788_v28 = vpop.permute.xlu0 %1151 }
  0xad   : > { %4257 = vst [vmem:[#allocation13_spill] sm:$0xff] %v2786_v27  ;;  %4258 = vst [vmem:[#allocation14_spill] sm:$0xff] %v2788_v28 }
  0xb0   : > { %v2790_v29 = vpop.permute.xlu1 %1166  ;;  %v2792_v30 = vpop.permute.xlu0 %1161 }
  0xb1   : > { %4259 = vst [vmem:[#allocation15_spill] sm:$0xff] %v2790_v29  ;;  %4260 = vst [vmem:[#allocation16_spill] sm:$0xff] %v2792_v30 }
  0xb4   : > { %v2794_v31 = vpop.permute.xlu1 %1176  ;;  %v2796_v32 = vpop.permute.xlu0 %1171 }
  0xb5   : > { %4261 = vst [vmem:[#allocation17_spill] sm:$0xff] %v2794_v31  ;;  %4262 = vst [vmem:[#allocation18_spill] sm:$0xff] %v2796_v32 }
  0xb8   : > { %v2798_v33 = vpop.permute.xlu1 %1186  ;;  %v2800_v34 = vpop.permute.xlu0 %1181 }
  0xb9   : > { %4263 = vst [vmem:[#allocation19_spill] sm:$0xff] %v2798_v33  ;;  %4264 = vst [vmem:[#allocation20_spill] sm:$0xff] %v2800_v34 }
  0xbc   : > { %v2802_v35 = vpop.permute.xlu1 %1196  ;;  %v2804_v36 = vpop.permute.xlu0 %1191 }
  0xc0   : > { %v2806_v37 = vpop.permute.xlu1 %1206  ;;  %v2808_v38 = vpop.permute.xlu0 %1201 }
  0xc4   : > { %v2810_v39 = vpop.permute.xlu1 %1216  ;;  %v2812_v40 = vpop.permute.xlu0 %1211 }
  0xc8   : > { %v2814_v41 = vpop.permute.xlu1 %1226  ;;  %v2816_v42 = vpop.permute.xlu0 %1221 }
  0xc9   : > { %4265 = vst [vmem:[#allocation21_spill] sm:$0xff] %v2814_v41  ;;  %4266 = vst [vmem:[#allocation22_spill] sm:$0xff] %v2816_v42 }
  0xcc   : > { %v2818_v43 = vpop.permute.xlu1 %1236  ;;  %v2820_v44 = vpop.permute.xlu0 %1231 }
  0xcd   : > { %4267 = vst [vmem:[#allocation23_spill] sm:$0xff] %v2818_v43  ;;  %4268 = vst [vmem:[#allocation24_spill] sm:$0xff] %v2820_v44 }
  0xd0   : > { %v2822_v45 = vpop.permute.xlu1 %1246  ;;  %v2824_v46 = vpop.permute.xlu0 %1241 }
  0xd1   : > { %4269 = vst [vmem:[#allocation25_spill] sm:$0xff] %v2822_v45  ;;  %4270 = vst [vmem:[#allocation26_spill] sm:$0xff] %v2824_v46 }
  0xd4   : > { %v2826_v47 = vpop.permute.xlu1 %1256  ;;  %v2828_v48 = vpop.permute.xlu0 %1251 }
  0xd5   : > { %4271 = vst [vmem:[#allocation27_spill] sm:$0xff] %v2826_v47  ;;  %4272 = vst [vmem:[#allocation28_spill] sm:$0xff] %v2828_v48 }
  0xd8   : > { %v2830_v49 = vpop.permute.xlu1 %1266  ;;  %v2832_v50 = vpop.permute.xlu0 %1261 }
  0xd9   : > { %4273 = vst [vmem:[#allocation29_spill] sm:$0xff] %v2830_v49  ;;  %4274 = vst [vmem:[#allocation30_spill] sm:$0xff] %v2832_v50 }
  0xdc   : > { %v2834_v51 = vpop.permute.xlu1 %1340  ;;  %v2836_v52 = vpop.permute.xlu0 %1335 }
  0xdd   : > { %4275 = vst [vmem:[#allocation31_spill] sm:$0xff] %v2834_v51  ;;  %4276 = vst [vmem:[#allocation32_spill] sm:$0xff] %v2836_v52 }
  0xe0   : > { %v2838_v53 = vpop.permute.xlu1 %1350  ;;  %v2840_v54 = vpop.permute.xlu0 %1345 }
  0xe1   : > { %4277 = vst [vmem:[#allocation33_spill] sm:$0xff] %v2838_v53 }
  0xe4   : > { %v2842_v55 = vpop.permute.xlu1 %1360  ;;  %v2844_v56 = vpop.permute.xlu0 %1355 }
  0xe5   : > { %4278 = vst [vmem:[#allocation34_spill] sm:$0xff] %v2842_v55  ;;  %4279 = vst [vmem:[#allocation35_spill] sm:$0xff] %v2844_v56  ;;  %v1589_v55 = vlaneseq }
  0xe8   : > { %v2846_v57 = vpop.permute.xlu1 %1370  ;;  %v2848_v58 = vpop.permute.xlu0 %1365 }
  0xe9   : > { %4280 = vst [vmem:[#allocation36_spill] sm:$0xff] %v2846_v57  ;;  %4281 = vst [vmem:[#allocation37_spill] sm:$0xff] %v2848_v58 }
  0xec   : > { %v2850_v59 = vpop.permute.xlu1 %1380  ;;  %v2852_v60 = vpop.permute.xlu0 %1375 }
  0xed   : > { %4282 = vst [vmem:[#allocation38_spill] sm:$0xff] %v2850_v59  ;;  %4283 = vst [vmem:[#allocation39_spill] sm:$0xff] %v2852_v60 }
  0xf0   : > { %v2856_v62 = vpop.permute.xlu1 %1390  ;;  %v2872_v6 = vpop.permute.xlu0 %1385 }
  0xf1   : > { %4285 = vst [vmem:[#allocation41_spill] sm:$0xff] %v2856_v62  ;;  %4288 = vst [vmem:[#allocation44_spill] sm:$0xff] %v2872_v6 }
  0xf2   : > { %v2854_v61 = vpop.f32.mrb[0].mxu0  ;;  %v2860_v0 = vpop.f32.mrb[0].mxu1 }
  0xf3   : > { %4284 = vst [vmem:[#allocation40_spill] sm:$0xff] %v2854_v61  ;;  %v535_v63 = vmul.f32 %v2854_v61, %v2854_v61  ;;  %v551_v1 = vmul.f32 %v2860_v0, %v2860_v0  ;;  %v2864_v2 = vpop.f32.mrb[1].mxu0  ;;  %v2866_v3 = vpop.f32.mrb[1].mxu1  ;;  %v2895_v50 = vmul.f32 0.87758255, %v2854_v61 }
  0xf4   : > { %4286 = vst [vmem:[#allocation42_spill] sm:$0xff] %v2864_v2  ;;  %v533_v4 = vmul.f32 %v2864_v2, %v2864_v2  ;;  %v2870_v5 = vpop.f32.mrb[2].mxu0  ;;  %v549_v8 = vmul.f32 %v2866_v3, %v2866_v3  ;;  %v2876_v9 = vpop.f32.mrb[2].mxu1  ;;  %v2932_v28 = vmul.f32 0.87758255, %v2864_v2 }
  0xf5   : > { %4287 = vst [vmem:[#allocation43_spill] sm:$0xff] %v2870_v5  ;;  %v567_v7 = vsub.f32 1.0, %v535_v63  ;;  %v583_v10 = vsub.f32 1.0, %v551_v1  ;;  %v536_v11 = vmul.f32 %v2870_v5, %v2870_v5  ;;  %v2880_v12 = vpop.f32.mrb[3].mxu0  ;;  %v2882_v13 = vpop.f32.mrb[3].mxu1  ;;  %v552_v16 = vmul.f32 %v2876_v9, %v2876_v9  ;;  %4293 = vst [vmem:[#allocation49_spill] sm:$0xff] %v2895_v50 }
  0xf6   : > { %4289 = vst [vmem:[#allocation45_spill] sm:$0xff] %v2880_v12  ;;  %v565_v14 = vsub.f32 1.0, %v533_v4  ;;  %v581_v15 = vsub.f32 1.0, %v549_v8  ;;  %v2886_v18 = vpop.permute.xlu1 %1400  ;;  %v2897_v4 = vpop.permute.xlu0 %1395  ;;  %4299 = vst [vmem:[#allocation55_spill] sm:$0xff] %v2932_v28  ;;  %v2937_v23 = vadd.f32 -0.23971277, %v2864_v2 }
  0xf7   : > { %v599_v17 = vmax.f32 %v567_v7, 0.0  ;;  %4290 = vst [vmem:[#allocation46_spill] sm:$0xff] %v2886_v18  ;;  %v584_v49 = vsub.f32 1.0, %v552_v16  ;;  %v615_v1 = vmax.f32 %v583_v10, 0.0  ;;  %v568_v33 = vsub.f32 1.0, %v536_v11  ;;  %4294 = vst [vmem:[#allocation50_spill] sm:$0xff] %v2897_v4 }
  0xf8   : > { %v613_v63 = vmax.f32 %v581_v15, 0.0  ;;  %v597_v8 = vmax.f32 %v565_v14, 0.0  ;;  %v2904_v15 = vadd.f32 -0.23971277, %v2854_v61  ;;  %v534_v4 = vmul.f32 %v2880_v12, %v2880_v12  ;;  %4300 = vst [vmem:[#allocation56_spill] sm:$0xff] %v2937_v23 }
  0xf9   : > { %v616_v16 = vmax.f32 %v584_v49, 0.0  ;;  %v2910_v18 = vmin.f32 %v599_v17, 1.0  ;;  %v550_v14 = vmul.f32 %v2882_v13, %v2882_v13  ;;  %v2921_v27 = vmin.f32 %v615_v1, 1.0 }
  0xfa   : > { %v2888_v47 = vpop.f32.mrb[4].mxu0  ;;  %v2890_v31 = vpop.f32.mrb[4].mxu1  ;;  %v2899_v34 = vmin.f32 %v613_v63, 1.0  ;;  %4295 = vst [vmem:[#allocation51_spill] sm:$0xff] %v2904_v15  ;;  %v2924_v49 = vmul.f32 0.87758255, %v2860_v0 }
  0xfb   : > { %4291 = vst [vmem:[#allocation47_spill] sm:$0xff] %v2888_v47  ;;  %v2892_v32 = vpop.f32.mrb[5].mxu0  ;;  %v2901_v7 = vpop.f32.mrb[5].mxu1  ;;  %4296 = vst [vmem:[#allocation52_spill] sm:$0xff] %v2910_v18  ;;  %v2927_v17 = vadd.f32 -0.23971277, %v2860_v0  ;;  %v539_v30 = vmul.f32 %v2888_v47, %v2888_v47 }
  0xfc   : > { %4292 = vst [vmem:[#allocation48_spill] sm:$0xff] %v2892_v32  ;;  %v2906_v10 = vpop.f32.mrb[6].mxu0  ;;  %v2908_v11 = vpop.f32.mrb[6].mxu1  ;;  %2233 = vrsqrt.f32 %v2899_v34  ;;  %v600_v29 = vmax.f32 %v568_v33, 0.0  ;;  %v2929_v62 = vmin.f32 %v597_v8, 1.0  ;;  %v582_v60 = vsub.f32 1.0, %v550_v14 }
  0xfd   : > { %v2917_v63 = vpop.f32.mrb[7].mxu0  ;;  %v2919_v59 = vpop.f32.mrb[7].mxu1  ;;  %v2940_v1 = vmul.f32 0.87758255, %v2866_v3  ;;  %v2942_v6 = vmin.f32 %v616_v16, 1.0  ;;  %2235 = vrsqrt.f32 %v2910_v18  ;;  %v566_v8 = vsub.f32 1.0, %v534_v4 }
  0xfe   : > { %4297 = vst [vmem:[#allocation53_spill] sm:$0xff] %v2917_v63  ;;  %4298 = vst [vmem:[#allocation54_spill] sm:$0xff] %v2929_v62  ;;  %v2946_v33 = vadd.f32 -0.23971277, %v2866_v3  ;;  %v614_v25 = vmax.f32 %v582_v60, 0.0  ;;  %2237 = vrsqrt.f32 %v2921_v27  ;;  %v2951_v57 = vmin.f32 %v600_v29, 1.0  ;;  %v2959_v56 = vpop.permute.xlu1 %1410  ;;  %v2966_v60 = vpop.permute.xlu0 %1405 }
  0xff   : > { %v2954_v24 = vmul.f32 0.87758255, %v2870_v5  ;;  %v2957_v16 = vadd.f32 -0.23971277, %v2870_v5  ;;  %4305 = vst [vmem:[#allocation61_spill] sm:$0xff] %v2959_v56  ;;  %2239 = vrsqrt.f32 %v2929_v62  ;;  %4306 = vst [vmem:[#allocation62_spill] sm:$0xff] %v2966_v60  ;;  %v555_v29 = vmul.f32 %v2890_v31, %v2890_v31 }
 0x100   : > { %4302 = vst [vmem:[#allocation58_spill] sm:$0xff] %v2951_v57  ;;  %v2964_v4 = vmin.f32 %v614_v25, 1.0  ;;  %v571_v58 = vsub.f32 1.0, %v539_v30  ;;  %2241 = vrsqrt.f32 %v2942_v6  ;;  %v2974_v51 = vmul.f32 0.87758255, %v2876_v9 }
 0x101   : > { %4303 = vst [vmem:[#allocation59_spill] sm:$0xff] %v2954_v24  ;;  %4304 = vst [vmem:[#allocation60_spill] sm:$0xff] %v2957_v16  ;;  %v2977_v56 = vadd.f32 -0.23971277, %v2876_v9  ;;  %v598_v53 = vmax.f32 %v566_v8, 0.0  ;;  %v2991_v5 = vand.u32 127, %v1589_v55 }
 0x102   : > { %v2948_v14 = vpop.f32.mrb[8].mxu0  ;;  %v2961_v26 = vpop.f32.mrb[8].mxu1  ;;  %v2984_v30 = vmul.f32 0.87758255, %v2880_v12  ;;  %2243 = vrsqrt.f32 %v2964_v4  ;;  %v2995_v24 = vadd.f32 -0.23971277, %v2880_v12 }
 0x103   : > { %4301 = vst [vmem:[#allocation57_spill] sm:$0xff] %v2948_v14  ;;  %v2970_v22 = vpop.f32.mrb[9].mxu0  ;;  %v2979_v21 = vpop.f32.mrb[9].mxu1  ;;  %4311 = vst [vmem:[#allocation67_spill] sm:$0xff] %v2991_v5  ;;  %2245 = vrsqrt.f32 %v2951_v57  ;;  %v2998_v20 = vmul.f32 0.87758255, %v2882_v13  ;;  %v553_v57 = vmul.f32 %v2901_v7, %v2901_v7  ;;  %v538_v5 = vmul.f32 %v2917_v63, %v2917_v63 }
 0x104   : > { %4307 = vst [vmem:[#allocation63_spill] sm:$0xff] %v2970_v22  ;;  %v2981_v25 = vpop.f32.mrb[10].mxu0  ;;  %4309 = vst [vmem:[#allocation65_spill] sm:$0xff] %v2984_v30  ;;  %v2987_v60 = vpop.f32.mrb[10].mxu1  ;;  %v3004_v30 = vmul.f32 %v2854_v61, %v2840_v54  ;;  %v3007_v28 = vadd.f32 -0.23971277, %v2882_v13  ;;  %v537_v54 = vmul.f32 %v2892_v32, %v2892_v32 }
 0x105   : > { %4308 = vst [vmem:[#allocation64_spill] sm:$0xff] %v2981_v25  ;;  %v2989_v16 = vpop.f32.mrb[11].mxu0  ;;  %4312 = vst [vmem:[#allocation68_spill] sm:$0xff] %v2995_v24  ;;  %v3000_v8 = vpop.f32.mrb[11].mxu1  ;;  %v603_v55 = vmax.f32 %v571_v58, 0.0  ;;  %v587_v48 = vsub.f32 1.0, %v555_v29 }
 0x106   : > { %4310 = vst [vmem:[#allocation66_spill] sm:$0xff] %v2989_v16  ;;  %4313 = vst [vmem:[#allocation69_spill] sm:$0xff] %v3004_v30  ;;  %v2234_v23 = vpop.eup %2233  ;;  %v3012_v24 = vmul.f32 0.87758255, %v2888_v47  ;;  %v3015_v12 = vadd.f32 -0.23971277, %v2888_v47  ;;  %v1421_v62 = vpop.permute.xlu1 %1420 }
 0x107   : > { %v774_v52 = vmul.f32 %v2234_v23, %v2899_v34  ;;  %v3020_v2 = vmin.f32 %v598_v53, 1.0  ;;  %vm775_vm1 = vcmp.eq.f32.partialorder %v2899_v34, inf  ;;  %v778_v58 = vand.u32 2147483648, %v2899_v34  ;;  %v1416_v23 = vpop.permute.xlu0 %1415  ;;  %v3036_v46 = vpop.eup %2235 }
 0x108   : > { %4314 = vst [vmem:[#allocation70_spill] sm:$0xff] %v3012_v24  ;;  %4315 = vst [vmem:[#allocation71_spill] sm:$0xff] %v3015_v12  ;;  %v585_v29 = vsub.f32 1.0, %v553_v57  ;;  %v3027_v24 = vmul.f32 0.87758255, %v2890_v31  ;;  %vm777_vm2 = vcmp.eq.f32.partialorder %v2899_v34, 0.0  ;;  %v2238_v45 = vpop.eup %2237  ;;  %v3043_v18 = vmul.f32 %v1421_v62, %v2882_v13 }
 0x109   : > { %4316 = vst [vmem:[#allocation72_spill] sm:$0xff] %v3020_v2  ;;  %v3030_v12 = vadd.f32 -0.23971277, %v2890_v31  ;;  %v776_v47 = vsel %vm775_vm1, %v2899_v34, %v774_v52  ;;  %4319 = vst [vmem:[#allocation75_spill] sm:$0xff] %v3036_v46  ;;  %v3038_v19 = vmin.f32 %v603_v55, 1.0  ;;  %v619_v57 = vmax.f32 %v587_v48, 0.0  ;;  %v3053_v48 = vpop.eup %2239 }
 0x10a   : > { %v3024_v30 = vpop.f32.mrb[12].mxu0  ;;  %v3034_v53 = vpop.f32.mrb[12].mxu1  ;;  %v779_v15 = vsel %vm777_vm2, %v778_v58, %v776_v47  ;;  %v617_v61 = vmax.f32 %v585_v29, 0.0  ;;  %v569_v43 = vsub.f32 1.0, %v537_v54  ;;  %v540_v52 = vmul.f32 %v2906_v10, %v2906_v10  ;;  %4324 = vst [vmem:[#allocation80_spill] sm:$0xff] %v3053_v48 }
 0x10b   : > { %4317 = vst [vmem:[#allocation73_spill] sm:$0xff] %v3024_v30  ;;  %4318 = vst [vmem:[#allocation74_spill] sm:$0xff] %v3030_v12  ;;  %v3040_v50 = vpop.f32.mrb[13].mxu0  ;;  %v556_v34 = vmul.f32 %v2908_v11, %v2908_v11  ;;  %v3049_v44 = vpop.f32.mrb[13].mxu1  ;;  %2247 = vrsqrt.f32 %v3020_v2  ;;  %v933_v47 = vmul.f32 0.47942555, %v779_v15  ;;  %v3058_v62 = vmul.f32 %v1416_v23, %v2866_v3 }
 0x10c   : > { %4320 = vst [vmem:[#allocation76_spill] sm:$0xff] %v3038_v19  ;;  %4321 = vst [vmem:[#allocation77_spill] sm:$0xff] %v3040_v50  ;;  %v3051_v55 = vpop.f32.mrb[14].mxu0  ;;  %vm997_vm3 = vcmp.gt.f32.partialorder %v2866_v3, -0.87758255  ;;  %v2242_v54 = vpop.eup %2241  ;;  %vm782_vm4 = vcmp.eq.f32.partialorder %v2964_v4, inf  ;;  %v554_v29 = vmul.f32 %v2919_v59, %v2919_v59  ;;  %2249 = vrsqrt.f32 %v3038_v19 }
 0x10d   : > { %4322 = vst [vmem:[#allocation78_spill] sm:$0xff] %v3049_v44  ;;  %4323 = vst [vmem:[#allocation79_spill] sm:$0xff] %v3051_v55  ;;  %vm784_vm5 = vcmp.eq.f32.partialorder %v2964_v4, 0.0  ;;  %v3062_v58 = vmin.f32 %v617_v61, 1.0  ;;  %v3066_v46 = vpop.f32.mrb[14].mxu1  ;;  %v3068_v48 = vpop.f32.mrb[15].mxu0  ;;  %v795_v12 = vmul.f32 %v2242_v54, %v2942_v6 }
 0x10e   : > { %4325 = vst [vmem:[#allocation81_spill] sm:$0xff] %v3066_v46  ;;  %4326 = vst [vmem:[#allocation82_spill] sm:$0xff] %v3068_v48  ;;  %v2244_v15 = vpop.eup %2243  ;;  %v3071_v2 = vmin.f32 %v619_v57, 1.0  ;;  %v785_v23 = vand.u32 2147483648, %v2964_v4  ;;  %v3076_v55 = vpop.f32.mrb[15].mxu1  ;;  %v601_v41 = vmax.f32 %v569_v43, 0.0  ;;  %v965_v48 = vsub.f32 %v2940_v1, %v933_v47 }
 0x10f   : > { %v3078_v61 = vpop.eup %2245  ;;  %v781_v42 = vmul.f32 %v2244_v15, %v2964_v4  ;;  %v572_v46 = vsub.f32 1.0, %v540_v52  ;;  %v588_v50 = vsub.f32 1.0, %v556_v34  ;;  %v3083_v19 = vmul.f32 0.87758255, %v2892_v32 }
 0x110   : > { %4327 = vst [vmem:[#allocation83_spill] sm:$0xff] %v3078_v61  ;;  %v586_v57 = vsub.f32 1.0, %v554_v29  ;;  %v3087_v44 = vadd.f32 -0.23971277, %v2892_v32  ;;  %2251 = vrsqrt.f32 %v3062_v58  ;;  %v3091_v61 = vmul.f32 0.87758255, %v2901_v7 }
 0x111   : > { %vm796_vm6 = vcmp.eq.f32.partialorder %v2942_v6, inf  ;;  %v783_v43 = vsel %vm782_vm4, %v2964_v4, %v781_v42  ;;  %v570_v1 = vsub.f32 1.0, %v538_v5  ;;  %v3098_v47 = vmin.f32 %v601_v41, 1.0 }
 0x112   : > { %4328 = vst [vmem:[#allocation84_spill] sm:$0xff] %v3087_v44  ;;  %v618_v52 = vmax.f32 %v586_v57, 0.0  ;;  %v797_v34 = vsel %vm796_vm6, %v2942_v6, %v795_v12  ;;  %v604_v54 = vmax.f32 %v572_v46, 0.0  ;;  %v620_v29 = vmax.f32 %v588_v50, 0.0 }
 0x113   : > { %v799_v15 = vand.u32 2147483648, %v2942_v6  ;;  %v1061_v44 = vsel %vm997_vm3, %v965_v48, %v2946_v33  ;;  %vm798_vm7 = vcmp.eq.f32.partialorder %v2942_v6, 0.0  ;;  %v788_v42 = vmul.f32 %v2238_v45, %v2921_v27 }
 0x114   : > { %v3104_v32 = vmin.f32 %v618_v52, 1.0  ;;  %v786_v5 = vsel %vm784_vm5, %v785_v23, %v783_v43  ;;  %vm789_vm8 = vcmp.eq.f32.partialorder %v2921_v27, inf  ;;  %v792_v41 = vand.u32 2147483648, %v2921_v27 }
 0x115   : > { %v800_v12 = vsel %vm798_vm7, %v799_v15, %v797_v34  ;;  %v3112_v46 = vpop.eup %2247  ;;  %v602_v50 = vmax.f32 %v570_v1, 0.0  ;;  %v790_v3 = vsel %vm789_vm8, %v2921_v27, %v788_v42  ;;  %vm791_vm9 = vcmp.eq.f32.partialorder %v2921_v27, 0.0 }
 0x116   : > { %2253 = vrsqrt.f32 %v3104_v32  ;;  %vm998_vm10 = vcmp.gt.f32.partialorder %v2882_v13, -0.87758255  ;;  %v3119_v45 = vadd.f32 -0.23971277, %v2901_v7  ;;  %v3122_v6 = vmul.f32 0.87758255, %v2906_v10  ;;  %v3127_v48 = vpop.eup %2249 }
 0x117   : > { %v3125_v33 = vadd.f32 -0.23971277, %v2906_v10  ;;  %v793_v4 = vsel %vm791_vm9, %v792_v41, %v790_v3  ;;  %2255 = vrsqrt.f32 %v3071_v2  ;;  %v934_v23 = vmul.f32 0.47942555, %v786_v5 }
 0x118   : > { %4329 = vst [vmem:[#allocation85_spill] sm:$0xff] %v3122_v6  ;;  %v3130_v57 = vmin.f32 %v604_v54, 1.0  ;;  %v936_v27 = vmul.f32 0.47942555, %v800_v12  ;;  %v1285_v43 = vmul.f32 %v2804_v36, %v1061_v44  ;;  %v3133_v1 = vmin.f32 %v620_v29, 1.0 }
 0x119   : > { %4330 = vst [vmem:[#allocation86_spill] sm:$0xff] %v3125_v33  ;;  %v935_v52 = vmul.f32 0.47942555, %v793_v4  ;;  %v543_v34 = vmul.f32 %v2948_v14, %v2948_v14  ;;  %2257 = vrsqrt.f32 %v3098_v47  ;;  %v3139_v15 = vmul.f32 0.87758255, %v2908_v11 }
 0x11a   : > { %v3142_v42 = vadd.f32 -0.23971277, %v2908_v11  ;;  %v3144_v5 = vmin.f32 %v602_v50, 1.0  ;;  %v2252_v54 = vpop.eup %2251  ;;  %v3147_v12 = vmul.f32 0.87758255, %v2917_v63  ;;  %v559_v29 = vmul.f32 %v2961_v26, %v2961_v26 }
 0x11b   : > { %v3150_v36 = vadd.f32 -0.23971277, %v2917_v63  ;;  %v3153_v44 = vmul.f32 0.87758255, %v2919_v59  ;;  %v966_v41 = vsub.f32 %v2998_v20, %v934_v23  ;;  %2259 = vrsqrt.f32 %v3130_v57 }
 0x11c   : > { %4331 = vst [vmem:[#allocation87_spill] sm:$0xff] %v3147_v12  ;;  %v3160_v50 = vadd.f32 -0.23971277, %v2919_v59  ;;  %v968_v3 = vsub.f32 %v2974_v51, %v936_v27  ;;  %v3164_v4 = vadd.f32 %v3058_v62, %v1285_v43  ;;  %2261 = vrsqrt.f32 %v3133_v1  ;;  %v1431_v27 = vpop.permute.xlu1 %1430 }
 0x11d   : > { %4332 = vst [vmem:[#allocation88_spill] sm:$0xff] %v3150_v36  ;;  %v967_v36 = vsub.f32 %v2924_v49, %v935_v52  ;;  %v575_v12 = vsub.f32 1.0, %v543_v34  ;;  %2263 = vrsqrt.f32 %v3144_v5  ;;  %vm1000_vm11 = vcmp.gt.f32.partialorder %v2876_v9, -0.87758255  ;;  %v1426_v34 = vpop.permute.xlu0 %1425 }
 0x11e   : > { %v802_v20 = vmul.f32 %v2252_v54, %v3062_v58  ;;  %vm803_vm12 = vcmp.eq.f32.partialorder %v3062_v58, inf  ;;  %vm999_vm13 = vcmp.gt.f32.partialorder %v2860_v0, -0.87758255  ;;  %v591_v23 = vsub.f32 1.0, %v559_v29 }
 0x11f   : > { %vm805_vm14 = vcmp.eq.f32.partialorder %v3062_v58, 0.0  ;;  %v806_v51 = vand.u32 2147483648, %v3062_v58  ;;  %v1062_v49 = vsel %vm998_vm10, %v966_v41, %v3007_v28  ;;  %v1064_v43 = vsel %vm1000_vm11, %v968_v3, %v2977_v56 }
 0x120   : > { %v2254_v62 = vpop.eup %2253  ;;  %vm810_vm15 = vcmp.eq.f32.partialorder %v3104_v32, inf  ;;  %v804_v52 = vsel %vm803_vm12, %v3062_v58, %v802_v20  ;;  %v1063_v54 = vsel %vm999_vm13, %v967_v36, %v2927_v17  ;;  %v607_v29 = vmax.f32 %v575_v12, 0.0 }
 0x121   : > { %v809_v63 = vmul.f32 %v2254_v62, %v3104_v32  ;;  %v813_v33 = vand.u32 2147483648, %v3104_v32  ;;  %v3184_v6 = vpop.eup %2255  ;;  %vm812_vm0 = vcmp.eq.f32.partialorder %v3104_v32, 0.0  ;;  %v807_v28 = vsel %vm805_vm14, %v806_v51, %v804_v52 }
 0x122   : > { %v541_v56 = vmul.f32 %v2970_v22, %v2970_v22  ;;  %v557_v13 = vmul.f32 %v2979_v21, %v2979_v21  ;;  %v1286_v58 = vmul.f32 %v2802_v35, %v1062_v49  ;;  %v1512_v17 = vmul.f32 %v2876_v9, %v1431_v27 }
 0x123   : > { %v623_v12 = vmax.f32 %v591_v23, 0.0  ;;  %v811_v36 = vsel %vm810_vm15, %v3104_v32, %v809_v63  ;;  %v3194_v41 = vpop.eup %2257  ;;  %v1511_v3 = vmul.f32 %v2860_v0, %v1426_v34  ;;  %v3198_v20 = vmul.f32 0.87758255, %v2948_v14  ;;  %v1441_v63 = vpop.permute.xlu1 %1440 }
 0x124   : > { %v3201_v51 = vadd.f32 -0.23971277, %v2948_v14  ;;  %v589_v62 = vsub.f32 1.0, %v557_v13  ;;  %v1288_v52 = vmul.f32 %v2806_v37, %v1064_v43  ;;  %v1287_v35 = vmul.f32 %v2808_v38, %v1063_v54  ;;  %v1436_v54 = vpop.permute.xlu0 %1435 }
 0x125   : > { %4333 = vst [vmem:[#allocation89_spill] sm:$0xff] %v3198_v20  ;;  %v814_v49 = vsel %vm812_vm0, %v813_v33, %v811_v36  ;;  %v937_v9 = vmul.f32 0.47942555, %v807_v28  ;;  %v3205_v23 = vpop.eup %2259  ;;  %v3207_v32 = vmin.f32 %v607_v29, 1.0  ;;  %v573_v27 = vsub.f32 1.0, %v541_v56 }
 0x126   : > { %4334 = vst [vmem:[#allocation90_spill] sm:$0xff] %v3201_v51  ;;  %v621_v0 = vmax.f32 %v589_v62, 0.0  ;;  %v544_v34 = vmul.f32 %v2981_v25, %v2981_v25  ;;  %v2262_v20 = vpop.eup %2261  ;;  %v3212_v51 = vadd.f32 %v3043_v18, %v1286_v58  ;;  %v3214_v13 = vmin.f32 %v623_v12, 1.0 }
 0x127   : > { %v3217_v37 = vmul.f32 0.87758255, %v2961_v26  ;;  %v3220_v38 = vadd.f32 -0.23971277, %v2961_v26  ;;  %v3222_v33 = vpop.eup %2263  ;;  %v938_v43 = vmul.f32 0.47942555, %v814_v49  ;;  %v560_v18 = vmul.f32 %v2987_v60, %v2987_v60 }
 0x128   : > { %vm1002_vm1 = vcmp.gt.f32.partialorder %v2919_v59, -0.87758255  ;;  %v3225_v29 = vmin.f32 %v621_v0, 1.0  ;;  %v3229_v28 = vadd.f32 %v1512_v17, %v1288_v52  ;;  %v3231_v56 = vadd.f32 %v1511_v3, %v1287_v35 }
 0x129   : > { %v1514_v58 = vmul.f32 %v1441_v63, %v2919_v59  ;;  %v969_v12 = vsub.f32 %v3091_v61, %v937_v9  ;;  %2265 = vrsqrt.f32 %v3207_v32  ;;  %vm1001_vm2 = vcmp.gt.f32.partialorder %v2901_v7, -0.87758255 }
 0x12a   : > { %v605_v36 = vmax.f32 %v573_v27, 0.0  ;;  %v576_v62 = vsub.f32 1.0, %v544_v34  ;;  %2267 = vrsqrt.f32 %v3214_v13  ;;  %v1513_v49 = vmul.f32 %v1436_v54, %v2901_v7 }
 0x12b   : > { %v542_v17 = vmul.f32 %v2989_v16, %v2989_v16  ;;  %v558_v3 = vmul.f32 %v3000_v8, %v3000_v8  ;;  %v970_v52 = vsub.f32 %v3153_v44, %v938_v43  ;;  %v3245_v61 = vmul.f32 0.87758255, %v2970_v22 }
 0x12c   : > { %2269 = vrsqrt.f32 %v3225_v29  ;;  %v592_v35 = vsub.f32 1.0, %v560_v18  ;;  %v1065_v9 = vsel %vm1001_vm2, %v969_v12, %v3119_v45  ;;  %v823_v27 = vmul.f32 %v2262_v20, %v3133_v1 }
 0x12d   : > { %4335 = vst [vmem:[#allocation91_spill] sm:$0xff] %v3245_v61  ;;  %v590_v63 = vsub.f32 1.0, %v558_v3  ;;  %vm824_vm3 = vcmp.eq.f32.partialorder %v3133_v1, inf  ;;  %v3251_v7 = vmin.f32 %v605_v36, 1.0  ;;  %v608_v0 = vmax.f32 %v576_v62, 0.0 }
 0x12e   : > { %vm826_vm4 = vcmp.eq.f32.partialorder %v3133_v1, 0.0  ;;  %v827_v44 = vand.u32 2147483648, %v3133_v1  ;;  %v574_v34 = vsub.f32 1.0, %v542_v17  ;;  %v825_v54 = vsel %vm824_vm3, %v3133_v1, %v823_v27 }
 0x12f   : > { %4336 = vst [vmem:[#allocation92_spill] sm:$0xff] %v3251_v7  ;;  %v622_v43 = vmax.f32 %v590_v63, 0.0  ;;  %v816_v18 = vmul.f32 %v3184_v6, %v3071_v2  ;;  %v1066_v45 = vsel %vm1002_vm1, %v970_v52, %v3160_v50  ;;  %v624_v20 = vmax.f32 %v592_v35, 0.0 }
 0x130   : > { %vm817_vm5 = vcmp.eq.f32.partialorder %v3071_v2, inf  ;;  %vm819_vm6 = vcmp.eq.f32.partialorder %v3071_v2, 0.0  ;;  %v828_v36 = vsel %vm826_vm4, %v827_v44, %v825_v54  ;;  %v820_v17 = vand.u32 2147483648, %v3071_v2 }
 0x131   : > { %v3263_v12 = vmin.f32 %v622_v43, 1.0  ;;  %v818_v62 = vsel %vm817_vm5, %v3071_v2, %v816_v18  ;;  %v1289_v1 = vmul.f32 %v2812_v40, %v1065_v9  ;;  %v3269_v6 = vadd.f32 -0.23971277, %v2970_v22 }
 0x132   : > { %v3272_v59 = vmul.f32 0.87758255, %v2979_v21  ;;  %v3275_v50 = vadd.f32 -0.23971277, %v2979_v21  ;;  %v3277_v3 = vmin.f32 %v608_v0, 1.0  ;;  %v606_v52 = vmax.f32 %v574_v34, 0.0 }
 0x133   : > { %4337 = vst [vmem:[#allocation93_spill] sm:$0xff] %v3269_v6  ;;  %2271 = vrsqrt.f32 %v3263_v12  ;;  %v821_v35 = vsel %vm819_vm6, %v820_v17, %v818_v62  ;;  %v3280_v63 = vpop.eup %2265  ;;  %v1290_v2 = vmul.f32 %v2810_v39, %v1066_v45  ;;  %v3284_v40 = vmul.f32 0.87758255, %v2981_v25 }
 0x134   : > { %4338 = vst [vmem:[#allocation94_spill] sm:$0xff] %v3277_v3  ;;  %v940_v9 = vmul.f32 0.47942555, %v828_v36  ;;  %v547_v27 = vmul.f32 %v3024_v30, %v3024_v30  ;;  %v3288_v44 = vpop.eup %2267  ;;  %2273 = vrsqrt.f32 %v3251_v7  ;;  %v3292_v0 = vadd.f32 -0.23971277, %v2981_v25  ;;  %v1446_v25 = vpop.permute.xlu0 %1445 }
 0x135   : > { %4339 = vst [vmem:[#allocation95_spill] sm:$0xff] %v3284_v40  ;;  %v3294_v34 = vmin.f32 %v624_v20, 1.0  ;;  %v3297_v43 = vmul.f32 0.87758255, %v2987_v60  ;;  %v3299_v54 = vadd.f32 %v1513_v49, %v1289_v1  ;;  %v3302_v18 = vadd.f32 -0.23971277, %v2987_v60 }
 0x136   : > { %4340 = vst [vmem:[#allocation96_spill] sm:$0xff] %v3292_v0  ;;  %v2270_v39 = vpop.eup %2269  ;;  %v939_v45 = vmul.f32 0.47942555, %v821_v35  ;;  %v563_v36 = vmul.f32 %v3034_v53, %v3034_v53  ;;  %2275 = vrsqrt.f32 %v3277_v3  ;;  %v3307_v62 = vmin.f32 %v606_v52, 1.0  ;;  %v1451_v0 = vpop.permute.xlu1 %1450 }
 0x137   : > { %v3310_v20 = vmul.f32 0.87758255, %v2989_v16  ;;  %v3313_v17 = vadd.f32 -0.23971277, %v2989_v16  ;;  %v3315_v49 = vadd.f32 %v1514_v58, %v1290_v2  ;;  %v3318_v1 = vmul.f32 0.87758255, %v3000_v8 }
 0x138   : > { %4341 = vst [vmem:[#allocation97_spill] sm:$0xff] %v3307_v62  ;;  %v972_v35 = vsub.f32 %v3139_v15, %v940_v9  ;;  %v579_v40 = vsub.f32 1.0, %v547_v27  ;;  %2277 = vrsqrt.f32 %v3294_v34  ;;  %v3323_v52 = vadd.f32 -0.23971277, %v3000_v8 }
 0x139   : > { %4342 = vst [vmem:[#allocation98_spill] sm:$0xff] %v3310_v20  ;;  %4343 = vst [vmem:[#allocation99_spill] sm:$0xff] %v3313_v17  ;;  %v830_v20 = vmul.f32 %v2270_v39, %v3225_v29  ;;  %vm831_vm7 = vcmp.eq.f32.partialorder %v3225_v29, inf  ;;  %vm1004_vm8 = vcmp.gt.f32.partialorder %v2908_v11, -0.87758255  ;;  %v1516_v58 = vmul.f32 %v2908_v11, %v1451_v0  ;;  %v4347_v0 = vld [vmem:[#allocation78_spill] sm:$0xff] }
 0x13a   : > { %4344 = vst [vmem:[#allocation100_spill] sm:$0xff] %v3315_v49  ;;  %v971_v2 = vsub.f32 %v3027_v24, %v939_v45  ;;  %v595_v17 = vsub.f32 1.0, %v563_v36  ;;  %2279 = vrsqrt.f32 %v3307_v62  ;;  %vm1003_vm9 = vcmp.gt.f32.partialorder %v2890_v31, -0.87758255  ;;  %v4349_v36 = vld [vmem:[#allocation77_spill] sm:$0xff]  ;;  %v4356_v49 = vld [vmem:[#allocation22_spill] sm:$0xff] }
 0x13b   : > { %v1515_v15 = vmul.f32 %v2890_v31, %v1446_v25  ;;  %v834_v9 = vand.u32 2147483648, %v3225_v29  ;;  %v1068_v27 = vsel %vm1004_vm8, %v972_v35, %v3142_v42  ;;  %v611_v39 = vmax.f32 %v579_v40, 0.0  ;;  %v4348_v25 = vld [vmem:[#allocation74_spill] sm:$0xff]  ;;  %v4351_v35 = vld [vmem:[#allocation21_spill] sm:$0xff] }
 0x13c   : > { %v832_v16 = vsel %vm831_vm7, %v3225_v29, %v830_v20  ;;  %vm833_vm10 = vcmp.eq.f32.partialorder %v3225_v29, 0.0  ;;  %v3338_v11 = vmul.f32 0.87758255, %v3024_v30  ;;  %v3341_v24 = vadd.f32 -0.23971277, %v3024_v30 }
 0x13d   : > { %v2272_v6 = vpop.eup %2271  ;;  %vm838_vm11 = vcmp.eq.f32.partialorder %v3263_v12, inf  ;;  %v561_v31 = vmul.f32 %v4347_v0, %v4347_v0  ;;  %v1067_v45 = vsel %vm1003_vm9, %v971_v2, %v4348_v25  ;;  %v627_v42 = vmax.f32 %v595_v17, 0.0  ;;  %v4354_v17 = vld [vmem:[#allocation81_spill] sm:$0xff] }
 0x13e   : > { %4345 = vst [vmem:[#allocation101_spill] sm:$0xff] %v3338_v11  ;;  %4346 = vst [vmem:[#allocation102_spill] sm:$0xff] %v3341_v24  ;;  %v837_v40 = vmul.f32 %v2272_v6, %v3263_v12  ;;  %v545_v29 = vmul.f32 %v4349_v36, %v4349_v36  ;;  %v3350_v20 = vpop.eup %2273  ;;  %v1292_v11 = vmul.f32 %v4351_v35, %v1068_v27  ;;  %v3354_v30 = vmul.f32 0.87758255, %v3034_v53  ;;  %v1461_v24 = vpop.permute.xlu1 %1460 }
 0x13f   : > { %4350 = vst [vmem:[#allocation78_spill] sm:$0xff] %v3350_v20  ;;  %v835_v62 = vsel %vm833_vm10, %v834_v9, %v832_v16  ;;  %v593_v22 = vsub.f32 1.0, %v561_v31  ;;  %v3356_v61 = vmin.f32 %v611_v39, 1.0  ;;  %v3359_v2 = vadd.f32 -0.23971277, %v3034_v53  ;;  %v1456_v31 = vpop.permute.xlu0 %1455 }
 0x140   : > { %v841_v6 = vand.u32 2147483648, %v3263_v12  ;;  %v564_v25 = vmul.f32 %v4354_v17, %v4354_v17  ;;  %v3364_v3 = vpop.eup %2275  ;;  %v1291_v27 = vmul.f32 %v4356_v49, %v1067_v45  ;;  %v839_v35 = vsel %vm838_vm11, %v3263_v12, %v837_v40  ;;  %v4357_v45 = vld [vmem:[#allocation82_spill] sm:$0xff] }
 0x141   : > { %4352 = vst [vmem:[#allocation74_spill] sm:$0xff] %v3356_v61  ;;  %4353 = vst [vmem:[#allocation77_spill] sm:$0xff] %v3359_v2  ;;  %vm840_vm12 = vcmp.eq.f32.partialorder %v3263_v12, 0.0  ;;  %v625_v16 = vmax.f32 %v593_v22, 0.0  ;;  %v3371_v9 = vmin.f32 %v627_v42, 1.0  ;;  %v3374_v39 = vmul.f32 %v1461_v24, %v3000_v8  ;;  %v4358_v12 = vld [vmem:[#allocation79_spill] sm:$0xff] }
 0x142   : > { %4355 = vst [vmem:[#allocation21_spill] sm:$0xff] %v3364_v3  ;;  %v941_v2 = vmul.f32 0.47942555, %v835_v62  ;;  %v577_v20 = vsub.f32 1.0, %v545_v29  ;;  %v2278_v7 = vpop.eup %2277  ;;  %v3376_v14 = vadd.f32 %v1516_v58, %v1292_v11  ;;  %v596_v49 = vsub.f32 1.0, %v564_v25 }
 0x143   : > { %v3378_v3 = vmin.f32 %v625_v16, 1.0  ;;  %v546_v40 = vmul.f32 %v4357_v45, %v4357_v45  ;;  %2281 = vrsqrt.f32 %v3356_v61  ;;  %v842_v22 = vsel %vm840_vm12, %v841_v6, %v839_v35 }
 0x144   : > { %vm1005_vm13 = vcmp.gt.f32.partialorder %v2979_v21, -0.87758255  ;;  %v548_v24 = vmul.f32 %v4358_v12, %v4358_v12  ;;  %v3386_v42 = vpop.eup %2279  ;;  %v3388_v62 = vadd.f32 %v1515_v15, %v1291_v27  ;;  %v1517_v58 = vmul.f32 %v1456_v31, %v2979_v21 }
 0x145   : > { %4359 = vst [vmem:[#allocation22_spill] sm:$0xff] %v3386_v42  ;;  %2283 = vrsqrt.f32 %v3378_v3  ;;  %v578_v11 = vsub.f32 1.0, %v546_v40  ;;  %vm1006_vm14 = vcmp.gt.f32.partialorder %v3000_v8, -0.87758255  ;;  %v973_v29 = vsub.f32 %v3272_v59, %v941_v2 }
 0x146   : > { %2285 = vrsqrt.f32 %v3371_v9  ;;  %v609_v6 = vmax.f32 %v577_v20, 0.0  ;;  %v3396_v25 = vmul.f32 0.87758255, %v4349_v36  ;;  %v942_v35 = vmul.f32 0.47942555, %v842_v22 }
 0x147   : > { %v628_v16 = vmax.f32 %v596_v49, 0.0  ;;  %v610_v61 = vmax.f32 %v578_v11, 0.0  ;;  %v562_v15 = vmul.f32 %v3076_v55, %v3076_v55  ;;  %v3401_v27 = vadd.f32 -0.23971277, %v4349_v36  ;;  %v4362_v11 = vld [vmem:[#allocation67_spill] sm:$0xff] }
 0x148   : > { %4360 = vst [vmem:[#allocation82_spill] sm:$0xff] %v3396_v25  ;;  %v3404_v31 = vmul.f32 0.87758255, %v4347_v0  ;;  %v580_v40 = vsub.f32 1.0, %v548_v24  ;;  %v851_v42 = vmul.f32 %v2278_v7, %v3294_v34  ;;  %v3408_v59 = vadd.f32 -0.23971277, %v4347_v0 }
 0x149   : > { %4361 = vst [vmem:[#allocation103_spill] sm:$0xff] %v3401_v27  ;;  %v3410_v20 = vmin.f32 %v610_v61, 1.0  ;;  %v594_v2 = vsub.f32 1.0, %v562_v15  ;;  %vm852_vm15 = vcmp.eq.f32.partialorder %v3294_v34, inf  ;;  %v1069_v49 = vsel %vm1005_vm13, %v973_v29, %v3275_v50 }
 0x14a   : > { %v853_v22 = vsel %vm852_vm15, %v3294_v34, %v851_v42  ;;  %vm854_vm0 = vcmp.eq.f32.partialorder %v3294_v34, 0.0  ;;  %v855_v24 = vand.u32 2147483648, %v3294_v34  ;;  %vm1591_vm1 = vcmp.lt.s32.totalorder %v4362_v11, 16  ;;  %v4363_v42 = vld [vmem:[#allocation24_spill] sm:$0xff] }
 0x14b   : > { %v974_v7 = vsub.f32 %v3318_v1, %v942_v35  ;;  %v3421_v27 = vmin.f32 %v609_v6, 1.0  ;;  %v3423_v61 = vmin.f32 %v628_v16, 1.0  ;;  %2287 = vrsqrt.f32 %v3410_v20 }
 0x14c   : > { %v612_v15 = vmax.f32 %v580_v40, 0.0  ;;  %v626_v25 = vmax.f32 %v594_v2, 0.0  ;;  %v856_v21 = vsel %vm854_vm0, %v855_v24, %v853_v22  ;;  %v844_v50 = vmul.f32 %v3288_v44, %v3214_v13 }
 0x14d   : > { %v1293_v29 = vmul.f32 %v4363_v42, %v1069_v49  ;;  %v3430_v34 = vmul.f32 0.87758255, %v4358_v12  ;;  %vm845_vm2 = vcmp.eq.f32.partialorder %v3214_v13, inf  ;;  %v848_v1 = vand.u32 2147483648, %v3214_v13  ;;  %v3434_v6 = vpop.eup %2281 }
 0x14e   : > { %v3436_v35 = vmin.f32 %v626_v25, 1.0  ;;  %v944_v16 = vmul.f32 0.47942555, %v856_v21  ;;  %v846_v40 = vsel %vm845_vm2, %v3214_v13, %v844_v50  ;;  %vm847_vm3 = vcmp.eq.f32.partialorder %v3214_v13, 0.0  ;;  %v4367_v21 = vld [vmem:[#allocation23_spill] sm:$0xff] }
 0x14f   : > { %4364 = vst [vmem:[#allocation67_spill] sm:$0xff] %v3430_v34  ;;  %v2284_v2 = vpop.eup %2283  ;;  %v1070_v44 = vsel %vm1006_vm14, %v974_v7, %v3323_v52  ;;  %v3444_v49 = vadd.f32 -0.23971277, %v4358_v12  ;;  %2289 = vrsqrt.f32 %v3423_v61  ;;  %v3448_v22 = vmul.f32 0.87758255, %v4354_v17 }
 0x150   : > { %v3450_v25 = vpop.eup %2285  ;;  %2291 = vrsqrt.f32 %v3421_v27  ;;  %v3453_v24 = vmin.f32 %v612_v15, 1.0  ;;  %v3456_v13 = vadd.f32 -0.23971277, %v4354_v17  ;;  %vm859_vm4 = vcmp.eq.f32.partialorder %v3378_v3, inf }
 0x151   : > { %4365 = vst [vmem:[#allocation24_spill] sm:$0xff] %v3444_v49  ;;  %v3459_v8 = vadd.f32 %v1517_v58, %v1293_v29  ;;  %2293 = vrsqrt.f32 %v3436_v35  ;;  %v849_v52 = vsel %vm847_vm3, %v848_v1, %v846_v40  ;;  %v858_v7 = vmul.f32 %v2284_v2, %v3378_v3  ;;  %v1466_v49 = vpop.permute.xlu0 %1465  ;;  %v4368_v29 = vld [vmem:[#allocation52_spill] sm:$0xff]  ;;  %v4369_v1 = vld [vmem:[#allocation75_spill] sm:$0xff] }
 0x152   : > { %4366 = vst [vmem:[#allocation104_spill] sm:$0xff] %v3456_v13  ;;  %v1294_v50 = vmul.f32 %v4367_v21, %v1070_v44  ;;  %v3465_v42 = vmul.f32 0.87758255, %v4357_v45  ;;  %v976_v15 = vsub.f32 %v3297_v43, %v944_v16  ;;  %v862_v17 = vand.u32 2147483648, %v3378_v3 }
 0x153   : > { %v860_v13 = vsel %vm859_vm4, %v3378_v3, %v858_v7  ;;  %vm861_vm5 = vcmp.eq.f32.partialorder %v3378_v3, 0.0  ;;  %v1575_v58 = vmul.f32 64.0, %v3231_v56  ;;  %v676_v40 = vmul.f32 %v4369_v1, %v4368_v29  ;;  %v1471_v1 = vpop.permute.xlu1 %1470 }
 0x154   : > { %2295 = vrsqrt.f32 %v3453_v24  ;;  %v3476_v2 = vadd.f32 -0.23971277, %v4357_v45  ;;  %v943_v44 = vmul.f32 0.47942555, %v849_v52  ;;  %vm677_vm6 = vcmp.eq.f32.partialorder %v4368_v29, inf }
 0x155   : > { %v2288_v43 = vpop.eup %2287  ;;  %v3480_v16 = vmul.f32 0.87758255, %v3076_v55  ;;  %v3483_v7 = vadd.f32 -0.23971277, %v3076_v55  ;;  %v3487_v56 = vsel %vm1591_vm1, %v1575_v58, -1e+30  ;;  %v678_v3 = vsel %vm677_vm6, %v4368_v29, %v676_v40 }
 0x156   : > { %4370 = vst [vmem:[#allocation23_spill] sm:$0xff] %v3476_v2  ;;  %4372 = vst [vmem:[#allocation75_spill] sm:$0xff] %v3487_v56  ;;  %v3491_v21 = vadd.f32 %v3374_v39, %v1294_v50  ;;  %vm1008_vm7 = vcmp.gt.f32.partialorder %v2987_v60, -0.87758255  ;;  %v863_v52 = vsel %vm861_vm5, %v862_v17, %v860_v13  ;;  %1660 = vmax.xlane.f32.xlu1 %v3487_v56  ;;  %v680_v34 = vand.u32 2147483648, %v4368_v29 }
 0x157   : > { %4371 = vst [vmem:[#allocation52_spill] sm:$0xff] %v3483_v7  ;;  %vm754_vm8 = vcmp.eq.f32.partialorder %v3410_v20, inf  ;;  %vm756_vm9 = vcmp.eq.f32.partialorder %v3410_v20, 0.0  ;;  %v1072_v58 = vsel %vm1008_vm7, %v976_v15, %v3302_v18  ;;  %vm679_vm10 = vcmp.eq.f32.partialorder %v4368_v29, 0.0  ;;  %v1476_v7 = vpop.permute.xlu0 %1475  ;;  %v4374_v18 = vld [vmem:[#allocation25_spill] sm:$0xff] }
 0x158   : > { %4373 = vst [vmem:[#allocation105_spill] sm:$0xff] %v3491_v21  ;;  %v753_v40 = vmul.f32 %v2288_v43, %v3410_v20  ;;  %v757_v39 = vand.u32 2147483648, %v3410_v20  ;;  %v975_v50 = vsub.f32 %v3217_v37, %v943_v44  ;;  %v681_v17 = vsel %vm679_vm10, %v680_v34, %v678_v3  ;;  %v4375_v44 = vld [vmem:[#allocation49_spill] sm:$0xff] }
 0x159   : > { %v2290_v13 = vpop.eup %2289  ;;  %v1520_v56 = vmul.f32 %v2987_v60, %v1471_v1  ;;  %vm1007_vm11 = vcmp.gt.f32.partialorder %v2961_v26, -0.87758255  ;;  %v945_v21 = vmul.f32 0.47942555, %v863_v52  ;;  %v919_v12 = vmul.f32 0.47942555, %v681_v17 }
 0x15a   : > { %v3505_v2 = vpop.eup %2291  ;;  %vm866_vm12 = vcmp.eq.f32.partialorder %v3436_v35, inf  ;;  %vm868_vm13 = vcmp.eq.f32.partialorder %v3436_v35, 0.0  ;;  %v1296_v15 = vmul.f32 %v4374_v18, %v1072_v58  ;;  %v1519_v29 = vmul.f32 %v2961_v26, %v1466_v49  ;;  %v4376_v52 = vld [vmem:[#allocation40_spill] sm:$0xff]  ;;  %v4377_v58 = vld [vmem:[#allocation51_spill] sm:$0xff] }
 0x15b   : > { %v2294_v37 = vpop.eup %2293  ;;  %v869_v34 = vand.u32 2147483648, %v3436_v35  ;;  %vm1009_vm14 = vcmp.gt.f32.partialorder %v4347_v0, -0.87758255  ;;  %v3514_v60 = vmul.f32 %v1476_v7, %v4347_v0  ;;  %v951_v43 = vsub.f32 %v4375_v44, %v919_v12 }
 0x15c   : > { %v755_v3 = vsel %vm754_vm8, %v3410_v20, %v753_v40  ;;  %v1071_v1 = vsel %vm1007_vm11, %v975_v50, %v3220_v38  ;;  %vm983_vm15 = vcmp.gt.f32.partialorder %v4376_v52, -0.87758255  ;;  %v879_v26 = vmul.f32 %v2290_v13, %v3423_v61  ;;  %v4378_v38 = vld [vmem:[#allocation5_spill] sm:$0xff] }
 0x15d   : > { %v977_v49 = vsub.f32 %v3404_v31, %v945_v21  ;;  %v1047_v17 = vsel %vm983_vm15, %v951_v43, %v4377_v58  ;;  %vm880_vm0 = vcmp.eq.f32.partialorder %v3423_v61, inf  ;;  %v872_v7 = vmul.f32 %v3450_v25, %v3371_v9  ;;  %v4379_v21 = vld [vmem:[#allocation26_spill] sm:$0xff]  ;;  %v4380_v25 = vld [vmem:[#allocation69_spill] sm:$0xff] }
 0x15e   : > { %v3528_v12 = vpop.eup %2295  ;;  %v865_v18 = vmul.f32 %v2294_v37, %v3436_v35  ;;  %v3531_v40 = vadd.f32 %v1520_v56, %v1296_v15  ;;  %v1271_v50 = vmul.f32 %v4378_v38, %v1047_v17  ;;  %vm873_vm2 = vcmp.eq.f32.partialorder %v3371_v9, inf }
 0x15f   : > { %v758_v31 = vsel %vm756_vm9, %v757_v39, %v755_v3  ;;  %v1295_v13 = vmul.f32 %v4379_v21, %v1071_v1  ;;  %vm882_vm3 = vcmp.eq.f32.partialorder %v3423_v61, 0.0  ;;  %v883_v44 = vand.u32 2147483648, %v3423_v61  ;;  %v4381_v39 = vld [vmem:[#allocation54_spill] sm:$0xff]  ;;  %v4382_v3 = vld [vmem:[#allocation80_spill] sm:$0xff] }
 0x160   : > { %v1527_v43 = vadd.f32 %v4380_v25, %v1271_v50  ;;  %v881_v52 = vsel %vm880_vm0, %v3423_v61, %v879_v26  ;;  %v876_v56 = vand.u32 2147483648, %v3371_v9  ;;  %v1573_v15 = vmul.f32 64.0, %v3164_v4  ;;  %v4386_v25 = vld [vmem:[#allocation83_spill] sm:$0xff] }
 0x161   : > { %v1073_v37 = vsel %vm1009_vm14, %v977_v49, %v3408_v59  ;;  %v874_v20 = vsel %vm873_vm2, %v3371_v9, %v872_v7  ;;  %vm875_vm4 = vcmp.eq.f32.partialorder %v3371_v9, 0.0  ;;  %v662_v1 = vmul.f32 %v4382_v3, %v4381_v39  ;;  %v4383_v7 = vld [vmem:[#allocation42_spill] sm:$0xff]  ;;  %v4388_v3 = vld [vmem:[#allocation55_spill] sm:$0xff] }
 0x162   : > { %v867_v58 = vsel %vm866_vm12, %v3436_v35, %v865_v18  ;;  %v1559_v61 = vmul.f32 64.0, %v1527_v43  ;;  %v3556_v26 = vsel %vm1591_vm1, %v1573_v15, -1e+30  ;;  %vm663_vm5 = vcmp.eq.f32.partialorder %v4381_v39, inf  ;;  %v4384_v18 = vld [vmem:[#allocation32_spill] sm:$0xff] }
 0x163   : > { %v3559_v4 = vmul.f32 0.47942555, %v758_v31  ;;  %v884_v0 = vsel %vm882_vm3, %v883_v44, %v881_v52  ;;  %1656 = vmax.xlane.f32.xlu1 %v3556_v26  ;;  %v664_v9 = vsel %vm663_vm5, %v4381_v39, %v662_v1  ;;  %v666_v59 = vand.u32 2147483648, %v4381_v39  ;;  %v4385_v44 = vld [vmem:[#allocation58_spill] sm:$0xff]  ;;  %v4387_v52 = vld [vmem:[#allocation28_spill] sm:$0xff] }
 0x164   : > { %v3566_v49 = vsel %vm1591_vm1, %v1559_v61, -1e+30  ;;  %v877_v17 = vsel %vm875_vm4, %v876_v56, %v874_v20  ;;  %vm665_vm6 = vcmp.eq.f32.partialorder %v4381_v39, 0.0  ;;  %v1493_v38 = vmul.f32 %v4384_v18, %v4383_v7 }
 0x165   : > { %v870_v50 = vsel %vm868_vm13, %v869_v34, %v867_v58  ;;  %v3573_v31 = vadd.f32 %v1519_v29, %v1295_v13  ;;  %1628 = vmax.xlane.f32.xlu0 %v3566_v49  ;;  %v667_v21 = vsel %vm665_vm6, %v666_v59, %v664_v9  ;;  %v683_v43 = vmul.f32 %v4386_v25, %v4385_v44  ;;  %v4390_v9 = vld [vmem:[#allocation56_spill] sm:$0xff] }
 0x166   : > { %v3579_v15 = vmul.f32 %v4387_v52, %v1073_v37  ;;  %v3581_v56 = vmul.f32 0.47942555, %v884_v0  ;;  %v917_v20 = vmul.f32 0.47942555, %v667_v21  ;;  %vm684_vm7 = vcmp.eq.f32.partialorder %v4385_v44, inf  ;;  %v4389_v37 = vld [vmem:[#allocation72_spill] sm:$0xff] }
 0x167   : > { %v3586_v34 = vmul.f32 0.47942555, %v877_v17  ;;  %v685_v29 = vsel %vm684_vm7, %v4385_v44, %v683_v43  ;;  %v687_v13 = vand.u32 2147483648, %v4385_v44  ;;  %v3590_v39 = vmul.f32 0.47942555, %v870_v50  ;;  %v4391_v21 = vld [vmem:[#allocation6_spill] sm:$0xff] }
 0x168   : > { %v949_v1 = vsub.f32 %v4388_v3, %v917_v20  ;;  %vm686_vm8 = vcmp.eq.f32.partialorder %v4385_v44, 0.0  ;;  %v669_v58 = vmul.f32 %v3112_v46, %v4389_v37  ;;  %vm981_vm9 = vcmp.gt.f32.partialorder %v4383_v7, -0.87758255  ;;  %v4392_v25 = vld [vmem:[#allocation76_spill] sm:$0xff]  ;;  %v4393_v43 = vld [vmem:[#allocation59_spill] sm:$0xff] }
 0x169   : > { %v688_v61 = vsel %vm686_vm8, %v687_v13, %v685_v29  ;;  %vm670_vm10 = vcmp.eq.f32.partialorder %v4389_v37, inf  ;;  %v673_v0 = vand.u32 2147483648, %v4389_v37  ;;  %vm672_vm11 = vcmp.eq.f32.partialorder %v4389_v37, 0.0  ;;  %v4394_v13 = vld [vmem:[#allocation43_spill] sm:$0xff] }
 0x16a   : > { %v1045_v59 = vsel %vm981_vm9, %v949_v1, %v4390_v9  ;;  %v920_v17 = vmul.f32 0.47942555, %v688_v61  ;;  %v671_v18 = vsel %vm670_vm10, %v4389_v37, %v669_v58  ;;  %v979_v50 = vsub.f32 %v3354_v30, %v3586_v34  ;;  %v4395_v37 = vld [vmem:[#allocation60_spill] sm:$0xff]  ;;  %v4396_v61 = vld [vmem:[#allocation33_spill] sm:$0xff]  ;;  %v4432_v34 = vld [vmem:[#allocation91_spill] sm:$0xff] }
 0x16b   : > { %v1269_v44 = vmul.f32 %v4391_v21, %v1045_v59  ;;  %v674_v46 = vsel %vm672_vm11, %v673_v0, %v671_v18  ;;  %v704_v7 = vmul.f32 %v3127_v48, %v4392_v25  ;;  %vm705_vm12 = vcmp.eq.f32.partialorder %v4392_v25, inf  ;;  %v4397_v48 = vld [vmem:[#allocation65_spill] sm:$0xff]  ;;  %v4399_v18 = vld [vmem:[#allocation7_spill] sm:$0xff] }
 0x16c   : > { %v952_v52 = vsub.f32 %v4393_v43, %v920_v17  ;;  %v918_v20 = vmul.f32 0.47942555, %v674_v46  ;;  %vm707_vm13 = vcmp.eq.f32.partialorder %v4392_v25, 0.0  ;;  %vm984_vm14 = vcmp.gt.f32.partialorder %v4394_v13, -0.87758255  ;;  %v4398_v59 = vld [vmem:[#allocation45_spill] sm:$0xff] }
 0x16d   : > { %v1525_v29 = vadd.f32 %v1493_v38, %v1269_v44  ;;  %v706_v3 = vsel %vm705_vm12, %v4392_v25, %v704_v7  ;;  %v708_v1 = vand.u32 2147483648, %v4392_v25  ;;  %v1496_v0 = vmul.f32 %v4394_v13, %v4396_v61  ;;  %v4400_v38 = vld [vmem:[#allocation31_spill] sm:$0xff]  ;;  %v4401_v43 = vld [vmem:[#allocation68_spill] sm:$0xff]  ;;  %v4405_v61 = vld [vmem:[#allocation37_spill] sm:$0xff] }
 0x16e   : > { %v1048_v58 = vsel %vm984_vm14, %v952_v52, %v4395_v37  ;;  %v950_v9 = vsub.f32 %v4397_v48, %v918_v20  ;;  %vm982_vm15 = vcmp.gt.f32.partialorder %v4398_v59, -0.87758255  ;;  %v1494_v44 = vmul.f32 %v4400_v38, %v4398_v59  ;;  %v4406_v59 = vld [vmem:[#allocation71_spill] sm:$0xff] }
 0x16f   : > { %v1557_v17 = vmul.f32 64.0, %v1525_v29  ;;  %v1272_v21 = vmul.f32 %v4399_v18, %v1048_v58  ;;  %v709_v46 = vsel %vm707_vm13, %v708_v1, %v706_v3  ;;  %v1576_v25 = vmul.f32 64.0, %v3229_v28  ;;  %v4402_v29 = vld [vmem:[#allocation8_spill] sm:$0xff]  ;;  %v4403_v58 = vld [vmem:[#allocation47_spill] sm:$0xff]  ;;  %v4404_v3 = vld [vmem:[#allocation70_spill] sm:$0xff] }
 0x170   : > { %v1046_v7 = vsel %vm982_vm15, %v950_v9, %v4401_v43  ;;  %v923_v35 = vmul.f32 0.47942555, %v709_v46  ;;  %v690_v52 = vmul.f32 %v3194_v41, %v3098_v47  ;;  %vm987_vm0 = vcmp.gt.f32.partialorder %v4403_v58, -0.87758255  ;;  %v4407_v43 = vld [vmem:[#allocation12_spill] sm:$0xff] }
 0x171   : > { %v3627_v20 = vsel %vm1591_vm1, %v1557_v17, -1e+30  ;;  %v1528_v13 = vadd.f32 %v1496_v0, %v1272_v21  ;;  %v1270_v37 = vmul.f32 %v4402_v29, %v1046_v7  ;;  %v1499_v28 = vmul.f32 %v4403_v58, %v4405_v61  ;;  %v4408_v61 = vld [vmem:[#allocation48_spill] sm:$0xff] }
 0x172   : > { %1624 = vmax.xlane.f32.xlu0 %v3627_v20  ;;  %v955_v1 = vsub.f32 %v4404_v3, %v923_v35  ;;  %vm691_vm2 = vcmp.eq.f32.partialorder %v3098_v47, inf  ;;  %vm693_vm3 = vcmp.eq.f32.partialorder %v3098_v47, 0.0  ;;  %v694_v0 = vand.u32 2147483648, %v3098_v47 }
 0x173   : > { %v1560_v41 = vmul.f32 64.0, %v1528_v13  ;;  %v1526_v48 = vadd.f32 %v1494_v44, %v1270_v37  ;;  %v692_v9 = vsel %vm691_vm2, %v3098_v47, %v690_v52  ;;  %v1574_v18 = vmul.f32 64.0, %v3212_v51 }
 0x174   : > { %v1051_v17 = vsel %vm987_vm0, %v955_v1, %v4406_v59  ;;  %v1579_v21 = vmul.f32 64.0, %v3388_v62  ;;  %v711_v35 = vmul.f32 %v3205_v23, %v3130_v57  ;;  %v695_v7 = vsel %vm693_vm3, %v694_v0, %v692_v9  ;;  %v4411_v0 = vld [vmem:[#allocation10_spill] sm:$0xff] }
 0x175   : > { %v3646_v38 = vsel %vm1591_vm1, %v1560_v41, -1e+30  ;;  %v1558_v46 = vmul.f32 64.0, %v1526_v48  ;;  %v1275_v44 = vmul.f32 %v4407_v43, %v1051_v17  ;;  %v921_v47 = vmul.f32 0.47942555, %v695_v7  ;;  %v4410_v48 = vld [vmem:[#allocation35_spill] sm:$0xff] }
 0x176   : > { %1630 = vmax.xlane.f32.xlu0 %v3646_v38  ;;  %vm712_vm4 = vcmp.eq.f32.partialorder %v3130_v57, inf  ;;  %vm714_vm5 = vcmp.eq.f32.partialorder %v3130_v57, 0.0  ;;  %v715_v51 = vand.u32 2147483648, %v3130_v57  ;;  %v3659_v62 = vsel %vm1591_vm1, %v1576_v25, -1e+30  ;;  %v4412_v17 = vld [vmem:[#allocation85_spill] sm:$0xff] }
 0x177   : > { %v3655_v23 = vsel %vm1591_vm1, %v1558_v46, -1e+30  ;;  %v1531_v52 = vadd.f32 %v1499_v28, %v1275_v44  ;;  %v713_v13 = vsel %vm712_vm4, %v3130_v57, %v711_v35  ;;  %v3665_v29 = vsel %vm1591_vm1, %v1574_v18, -1e+30  ;;  %v4409_v28 = vld [vmem:[#allocation84_spill] sm:$0xff]  ;;  %v4414_v7 = vld [vmem:[#allocation86_spill] sm:$0xff] }
 0x178   : > { %1626 = vmax.xlane.f32.xlu1 %v3655_v23  ;;  %v3669_v37 = vsel %vm1591_vm1, %v1579_v21, -1e+30  ;;  %v953_v58 = vsub.f32 %v3083_v19, %v921_v47  ;;  %v716_v3 = vsel %vm714_vm5, %v715_v51, %v713_v13  ;;  %vm985_vm6 = vcmp.gt.f32.partialorder %v4408_v61, -0.87758255 }
 0x179   : > { %v1563_v1 = vmul.f32 64.0, %v1531_v52  ;;  %v924_v25 = vmul.f32 0.47942555, %v716_v3  ;;  %v697_v57 = vmul.f32 %v3222_v33, %v3144_v5  ;;  %v1497_v9 = vmul.f32 %v4410_v48, %v4408_v61  ;;  %v4413_v33 = vld [vmem:[#allocation36_spill] sm:$0xff]  ;;  %v4418_v48 = vld [vmem:[#allocation34_spill] sm:$0xff] }
 0x17a   : > { %1662 = vmax.xlane.f32.xlu0 %v3659_v62  ;;  %v1049_v41 = vsel %vm985_vm6, %v953_v58, %v4409_v28  ;;  %vm988_vm7 = vcmp.gt.f32.partialorder %v2906_v10, -0.87758255  ;;  %vm698_vm8 = vcmp.eq.f32.partialorder %v3144_v5, inf  ;;  %v1500_v21 = vmul.f32 %v2906_v10, %v4413_v33  ;;  %v4415_v10 = vld [vmem:[#allocation11_spill] sm:$0xff]  ;;  %v4422_v33 = vld [vmem:[#allocation78_spill] sm:$0xff] }
 0x17b   : > { %v3683_v19 = vsel %vm1591_vm1, %v1563_v1, -1e+30  ;;  %v1273_v59 = vmul.f32 %v4411_v0, %v1049_v41  ;;  %v956_v18 = vsub.f32 %v4412_v17, %v924_v25  ;;  %v1577_v35 = vmul.f32 64.0, %v3299_v54  ;;  %v4416_v25 = vld [vmem:[#allocation53_spill] sm:$0xff]  ;;  %v4417_v28 = vld [vmem:[#allocation87_spill] sm:$0xff] }
 0x17c   : > { %1636 = vmax.xlane.f32.xlu1 %v3683_v19  ;;  %v699_v46 = vsel %vm698_vm8, %v3144_v5, %v697_v57  ;;  %vm700_vm9 = vcmp.eq.f32.partialorder %v3144_v5, 0.0  ;;  %v701_v43 = vand.u32 2147483648, %v3144_v5  ;;  %vm1011_vm10 = vcmp.gt.f32.partialorder %v3034_v53, -0.87758255 }
 0x17d   : > { %v1529_v44 = vadd.f32 %v1497_v9, %v1273_v59  ;;  %v1052_v47 = vsel %vm988_vm7, %v956_v18, %v4414_v7  ;;  %v732_v51 = vmul.f32 %v3280_v63, %v3207_v32  ;;  %vm733_vm11 = vcmp.eq.f32.partialorder %v3207_v32, inf  ;;  %v4421_v18 = vld [vmem:[#allocation92_spill] sm:$0xff] }
 0x17e   : > { %1658 = vmax.xlane.f32.xlu0 %v3665_v29  ;;  %v1276_v54 = vmul.f32 %v4415_v10, %v1052_v47  ;;  %v702_v52 = vsel %vm700_vm9, %v701_v43, %v699_v46  ;;  %vm735_vm12 = vcmp.eq.f32.partialorder %v3207_v32, 0.0  ;;  %v736_v13 = vand.u32 2147483648, %v3207_v32  ;;  %v4423_v46 = vld [vmem:[#allocation88_spill] sm:$0xff] }
 0x17f   : > { %v1561_v5 = vmul.f32 64.0, %v1529_v44  ;;  %v1580_v58 = vmul.f32 64.0, %v3376_v14  ;;  %v922_v3 = vmul.f32 0.47942555, %v702_v52  ;;  %v734_v1 = vsel %vm733_vm11, %v3207_v32, %v732_v51  ;;  %v4419_v14 = vld [vmem:[#allocation57_spill] sm:$0xff]  ;;  %v4420_v32 = vld [vmem:[#allocation44_spill] sm:$0xff] }
 0x180   : > { %1668 = vmax.xlane.f32.xlu1 %v3669_v37  ;;  %v1532_v63 = vadd.f32 %v1500_v21, %v1276_v54  ;;  %v3708_v61 = vsel %vm1591_vm1, %v1577_v35, -1e+30  ;;  %vm986_vm13 = vcmp.gt.f32.partialorder %v4416_v25, -0.87758255  ;;  %v737_v57 = vsel %vm735_vm12, %v736_v13, %v734_v1  ;;  %v4424_v44 = vld [vmem:[#allocation89_spill] sm:$0xff]  ;;  %v4426_v13 = vld [vmem:[#allocation90_spill] sm:$0xff] }
 0x181   : > { %v954_v41 = vsub.f32 %v4417_v28, %v922_v3  ;;  %v1498_v9 = vmul.f32 %v4418_v48, %v4416_v25  ;;  %v927_v0 = vmul.f32 0.47942555, %v737_v57  ;;  %vm991_vm14 = vcmp.gt.f32.partialorder %v4419_v14, -0.87758255  ;;  %v4425_v51 = vld [vmem:[#allocation9_spill] sm:$0xff]  ;;  %v4427_v3 = vld [vmem:[#allocation100_spill] sm:$0xff] }
 0x182   : > { %v1564_v59 = vmul.f32 64.0, %v1532_v63  ;;  %v1503_v17 = vmul.f32 %v4419_v14, %v4420_v32  ;;  %v718_v21 = vmul.f32 %v4422_v33, %v4421_v18  ;;  %vm719_vm15 = vcmp.eq.f32.partialorder %v4421_v18, inf  ;;  %v4428_v25 = vld [vmem:[#allocation94_spill] sm:$0xff]  ;;  %v4429_v57 = vld [vmem:[#allocation21_spill] sm:$0xff]  ;;  %v4430_v48 = vld [vmem:[#allocation16_spill] sm:$0xff] }
 0x183   : > { %v3722_v35 = vsel %vm1591_vm1, %v1561_v5, -1e+30  ;;  %v1050_v43 = vsel %vm986_vm13, %v954_v41, %v4423_v46  ;;  %v959_v7 = vsub.f32 %v4424_v44, %v927_v0  ;;  %vm721_vm0 = vcmp.eq.f32.partialorder %v4421_v18, 0.0  ;;  %v4431_v33 = vld [vmem:[#allocation77_spill] sm:$0xff] }
 0x184   : > { %1632 = vmax.xlane.f32.xlu1 %v3722_v35  ;;  %v3730_v47 = vsel %vm1591_vm1, %v1564_v59, -1e+30  ;;  %v1274_v10 = vmul.f32 %v4425_v51, %v1050_v43  ;;  %v720_v54 = vsel %vm719_vm15, %v4421_v18, %v718_v21  ;;  %v722_v52 = vand.u32 2147483648, %v4421_v18  ;;  %v4433_v51 = vld [vmem:[#allocation63_spill] sm:$0xff] }
 0x185   : > { %1638 = vmax.xlane.f32.xlu0 %v3730_v47  ;;  %v1055_v5 = vsel %vm991_vm14, %v959_v7, %v4426_v13  ;;  %v1578_v1 = vmul.f32 64.0, %v4427_v3  ;;  %v1583_v63 = vmul.f32 64.0, %v3573_v31  ;;  %v739_v28 = vmul.f32 %v4429_v57, %v4428_v25  ;;  %v4436_v13 = vld [vmem:[#allocation93_spill] sm:$0xff]  ;;  %v4437_v3 = vld [vmem:[#allocation39_spill] sm:$0xff] }
 0x186   : > { %v1530_v41 = vadd.f32 %v1498_v9, %v1274_v10  ;;  %v1279_v0 = vmul.f32 %v4430_v48, %v1055_v5  ;;  %v723_v14 = vsel %vm721_vm0, %v722_v52, %v720_v54  ;;  %vm740_vm2 = vcmp.eq.f32.partialorder %v4428_v25, inf  ;;  %v4434_v10 = vld [vmem:[#allocation97_spill] sm:$0xff]  ;;  %v4435_v54 = vld [vmem:[#allocation22_spill] sm:$0xff] }
 0x187   : > { %v925_v59 = vmul.f32 0.47942555, %v723_v14  ;;  %v741_v32 = vsel %vm740_vm2, %v4428_v25, %v739_v28  ;;  %vm742_vm3 = vcmp.eq.f32.partialorder %v4428_v25, 0.0  ;;  %v743_v18 = vand.u32 2147483648, %v4428_v25  ;;  %v4438_v25 = vld [vmem:[#allocation14_spill] sm:$0xff]  ;;  %v4439_v28 = vld [vmem:[#allocation95_spill] sm:$0xff] }
 0x188   : > { %v3752_v31 = vsel %vm1011_vm10, %v979_v50, %v4431_v33  ;;  %1664 = vmax.xlane.f32.xlu1 %v3708_v61  ;;  %v3757_v9 = vsel %vm1591_vm1, %v1580_v58, -1e+30  ;;  %v1562_v21 = vmul.f32 64.0, %v1530_v41  ;;  %v1535_v46 = vadd.f32 %v1503_v17, %v1279_v0  ;;  %v4440_v0 = vld [vmem:[#allocation64_spill] sm:$0xff]  ;;  %v4441_v14 = vld [vmem:[#allocation41_spill] sm:$0xff] }
 0x189   : > { %1670 = vmax.xlane.f32.xlu0 %v3757_v9  ;;  %v3762_v43 = vsel %vm1591_vm1, %v1578_v1, -1e+30  ;;  %v3766_v30 = vsel %vm1591_vm1, %v1583_v63, -1e+30  ;;  %v957_v50 = vsub.f32 %v4432_v34, %v925_v59  ;;  %v744_v44 = vsel %vm742_vm3, %v743_v18, %v741_v32  ;;  %v4442_v33 = vld [vmem:[#allocation96_spill] sm:$0xff] }
 0x18a   : > { %v1567_v7 = vmul.f32 64.0, %v1535_v46  ;;  %vm989_vm4 = vcmp.gt.f32.partialorder %v4433_v51, -0.87758255  ;;  %v928_v58 = vmul.f32 0.47942555, %v744_v44  ;;  %v725_v17 = vmul.f32 %v4435_v54, %v4434_v10  ;;  %v4443_v46 = vld [vmem:[#allocation74_spill] sm:$0xff] }
 0x18b   : > { %v3774_v52 = vsel %vm1591_vm1, %v1562_v21, -1e+30  ;;  %v1053_v5 = vsel %vm989_vm4, %v957_v50, %v4436_v13  ;;  %v1501_v1 = vmul.f32 %v4437_v3, %v4433_v51  ;;  %vm726_vm5 = vcmp.eq.f32.partialorder %v4434_v10, inf  ;;  %v4444_v50 = vld [vmem:[#allocation15_spill] sm:$0xff] }
 0x18c   : > { %v3782_v63 = vsel %vm1591_vm1, %v1567_v7, -1e+30  ;;  %v1277_v57 = vmul.f32 %v4438_v25, %v1053_v5  ;;  %v960_v41 = vsub.f32 %v4439_v28, %v928_v58  ;;  %v727_v48 = vsel %vm726_vm5, %v4434_v10, %v725_v17  ;;  %v4445_v5 = vld [vmem:[#allocation66_spill] sm:$0xff]  ;;  %v4447_v28 = vld [vmem:[#allocation73_spill] sm:$0xff] }
 0x18d   : > { %1634 = vmax.xlane.f32.xlu0 %v3774_v52  ;;  %1644 = vmax.xlane.f32.xlu1 %v3782_v63  ;;  %vm992_vm6 = vcmp.gt.f32.partialorder %v4440_v0, -0.87758255  ;;  %v1504_v59 = vmul.f32 %v4440_v0, %v4441_v14  ;;  %vm728_vm7 = vcmp.eq.f32.partialorder %v4434_v10, 0.0  ;;  %v729_v32 = vand.u32 2147483648, %v4434_v10  ;;  %v4449_v14 = vld [vmem:[#allocation101_spill] sm:$0xff] }
 0x18e   : > { %v1533_v18 = vadd.f32 %v1501_v1, %v1277_v57  ;;  %v1056_v21 = vsel %vm992_vm6, %v960_v41, %v4442_v33  ;;  %v760_v34 = vmul.f32 %v3434_v6, %v4443_v46  ;;  %vm761_vm8 = vcmp.eq.f32.partialorder %v4443_v46, inf  ;;  %v4446_v1 = vld [vmem:[#allocation98_spill] sm:$0xff] }
 0x18f   : > { %v1280_v44 = vmul.f32 %v4444_v50, %v1056_v21  ;;  %v730_v7 = vsel %vm728_vm7, %v729_v32, %v727_v48  ;;  %vm763_vm9 = vcmp.eq.f32.partialorder %v4443_v46, 0.0  ;;  %v764_v51 = vand.u32 2147483648, %v4443_v46  ;;  %v4450_v21 = vld [vmem:[#allocation13_spill] sm:$0xff] }
 0x190   : > { %vm994_vm10 = vcmp.gt.f32.partialorder %v4357_v45, -0.87758255  ;;  %v1565_v58 = vmul.f32 64.0, %v1533_v18  ;;  %v1581_v10 = vmul.f32 64.0, %v3459_v8  ;;  %v926_v54 = vmul.f32 0.47942555, %v730_v7 }
 0x191   : > { %v762_v17 = vsel %vm761_vm8, %v4443_v46, %v760_v34  ;;  %1666 = vmax.xlane.f32.xlu0 %v3762_v43  ;;  %1676 = vmax.xlane.f32.xlu1 %v3766_v30  ;;  %v1536_v6 = vadd.f32 %v1504_v59, %v1280_v44  ;;  %v1584_v13 = vmul.f32 64.0, %v3531_v40  ;;  %vm990_vm11 = vcmp.gt.f32.partialorder %v4445_v5, -0.87758255  ;;  %v4448_v40 = vld [vmem:[#allocation99_spill] sm:$0xff]  ;;  %v4451_v34 = vld [vmem:[#allocation38_spill] sm:$0xff] }
 0x192   : > { %v765_v3 = vsel %vm763_vm9, %v764_v51, %v762_v17  ;;  %v958_v25 = vsub.f32 %v4446_v1, %v926_v54  ;;  %vm995_vm12 = vcmp.gt.f32.partialorder %v4447_v28, -0.87758255  ;;  %v746_v8 = vmul.f32 %v3505_v2, %v3421_v27  ;;  %v4452_v44 = vld [vmem:[#allocation102_spill] sm:$0xff]  ;;  %v4454_v17 = vld [vmem:[#allocation20_spill] sm:$0xff] }
 0x193   : > { %v931_v57 = vmul.f32 0.47942555, %v765_v3  ;;  %vm1010_vm13 = vcmp.gt.f32.partialorder %v3076_v55, -0.87758255  ;;  %v3815_v41 = vsel %vm1591_vm1, %v1565_v58, -1e+30  ;;  %v1502_v50 = vmul.f32 %v4451_v34, %v4445_v5 }
 0x194   : > { %v1568_v48 = vmul.f32 64.0, %v1536_v6  ;;  %vm747_vm14 = vcmp.eq.f32.partialorder %v3421_v27, inf  ;;  %vm749_vm15 = vcmp.eq.f32.partialorder %v3421_v27, 0.0  ;;  %v1054_v0 = vsel %vm990_vm11, %v958_v25, %v4448_v40  ;;  %v4453_v7 = vld [vmem:[#allocation62_spill] sm:$0xff] }
 0x195   : > { %v963_v59 = vsub.f32 %v4449_v14, %v931_v57  ;;  %v748_v32 = vsel %vm747_vm14, %v3421_v27, %v746_v8  ;;  %v750_v18 = vand.u32 2147483648, %v3421_v27  ;;  %1640 = vmax.xlane.f32.xlu1 %v3815_v41  ;;  %v3830_v33 = vsel %vm1591_vm1, %v1581_v10, -1e+30 }
 0x196   : > { %v3826_v2 = vsel %vm1591_vm1, %v1568_v48, -1e+30  ;;  %v1278_v46 = vmul.f32 %v4450_v21, %v1054_v0  ;;  %v1507_v51 = vmul.f32 %v4447_v28, %v4453_v7  ;;  %v767_v54 = vmul.f32 %v3528_v12, %v3453_v24  ;;  %v4455_v28 = vld [vmem:[#allocation82_spill] sm:$0xff]  ;;  %v4464_v7 = vld [vmem:[#allocation67_spill] sm:$0xff] }
 0x197   : > { %1646 = vmax.xlane.f32.xlu0 %v3826_v2  ;;  %v1059_v27 = vsel %vm995_vm12, %v963_v59, %v4452_v44  ;;  %v751_v58 = vsel %vm749_vm15, %v750_v18, %v748_v32  ;;  %vm768_vm0 = vcmp.eq.f32.partialorder %v3453_v24, inf  ;;  %vm993_vm2 = vcmp.gt.f32.partialorder %v4349_v36, -0.87758255  ;;  %v4456_v59 = vld [vmem:[#allocation103_spill] sm:$0xff] }
 0x198   : > { %v1534_v10 = vadd.f32 %v1502_v50, %v1278_v46  ;;  %v1283_v6 = vmul.f32 %v4454_v17, %v1059_v27  ;;  %v929_v3 = vmul.f32 0.47942555, %v751_v58  ;;  %v769_v5 = vsel %vm768_vm0, %v3453_v24, %v767_v54  ;;  %v4457_v18 = vld [vmem:[#allocation23_spill] sm:$0xff]  ;;  %v4460_v46 = vld [vmem:[#allocation18_spill] sm:$0xff]  ;;  %v4466_v54 = vld [vmem:[#allocation81_spill] sm:$0xff] }
 0x199   : > { %vm770_vm3 = vcmp.eq.f32.partialorder %v3453_v24, 0.0  ;;  %v771_v1 = vand.u32 2147483648, %v3453_v24  ;;  %1672 = vmax.xlane.f32.xlu1 %v3830_v33  ;;  %v3852_v25 = vsel %vm1591_vm1, %v1584_v13, -1e+30  ;;  %v978_v48 = vsub.f32 %v3480_v16, %v3590_v39  ;;  %v1486_v39 = vpop.permute.xlu0 %1485  ;;  %v4462_v50 = vld [vmem:[#allocation79_spill] sm:$0xff] }
 0x19a   : > { %v1566_v12 = vmul.f32 64.0, %v1534_v10  ;;  %v1539_v57 = vadd.f32 %v1507_v51, %v1283_v6  ;;  %v961_v8 = vsub.f32 %v4455_v28, %v929_v3  ;;  %v1553_v40 = vadd.f32 %v3514_v60, %v3579_v15  ;;  %v4459_v60 = vld [vmem:[#allocation30_spill] sm:$0xff]  ;;  %v4467_v10 = vld [vmem:[#allocation17_spill] sm:$0xff]  ;;  %v1481_v6 = vpop.permute.xlu1 %1480 }
 0x19b   : > { %v980_v0 = vsub.f32 %v3448_v22, %v3581_v56  ;;  %1678 = vmax.xlane.f32.xlu0 %v3852_v25  ;;  %v772_v24 = vsel %vm770_vm3, %v771_v1, %v769_v5  ;;  %v4458_v21 = vsub.f32 %v3465_v42, %v3559_v4  ;;  %v1299_v15 = vmul.f32 %v4459_v60, %v3752_v31  ;;  %v4461_v56 = vld [vmem:[#allocation50_spill] sm:$0xff]  ;;  %v4463_v4 = vld [vmem:[#allocation105_spill] sm:$0xff]  ;;  %v4465_v31 = vld [vmem:[#allocation52_spill] sm:$0xff] }
 0x19c   : > { %v1571_v14 = vmul.f32 64.0, %v1539_v57  ;;  %v1057_v13 = vsel %vm993_vm2, %v961_v8, %v4456_v59  ;;  %v932_v32 = vmul.f32 0.47942555, %v772_v24  ;;  %v1505_v34 = vmul.f32 %v4461_v56, %v4349_v36  ;;  %v4468_v5 = vld [vmem:[#allocation24_spill] sm:$0xff]  ;;  %v4469_v57 = vld [vmem:[#allocation19_spill] sm:$0xff]  ;;  %v4470_v8 = vld [vmem:[#allocation61_spill] sm:$0xff] }
 0x19d   : > { %v1058_v16 = vsel %vm994_vm10, %v4458_v21, %v4457_v18  ;;  %v1281_v22 = vmul.f32 %v4460_v46, %v1057_v13  ;;  %vm996_vm4 = vcmp.gt.f32.partialorder %v4462_v50, -0.87758255  ;;  %v3877_v44 = vsel %vm1591_vm1, %v1566_v12, -1e+30  ;;  %v4471_v24 = vld [vmem:[#allocation46_spill] sm:$0xff]  ;;  %v4472_v59 = vld [vmem:[#allocation27_spill] sm:$0xff] }
 0x19e   : > { %v3881_v42 = vsel %vm1591_vm1, %v1571_v14, -1e+30  ;;  %v1582_v27 = vmul.f32 64.0, %v4463_v4  ;;  %v964_v51 = vsub.f32 %v4464_v7, %v932_v32  ;;  %v1074_v58 = vsel %vm1010_vm13, %v978_v48, %v4465_v31  ;;  %v4473_v32 = vld [vmem:[#allocation104_spill] sm:$0xff]  ;;  %v4474_v56 = vld [vmem:[#allocation29_spill] sm:$0xff] }
 0x19f   : > { %vm1012_vm5 = vcmp.gt.f32.partialorder %v4466_v54, -0.87758255  ;;  %1642 = vmax.xlane.f32.xlu0 %v3877_v44  ;;  %1652 = vmax.xlane.f32.xlu1 %v3881_v42  ;;  %v1537_v36 = vadd.f32 %v1505_v34, %v1281_v22  ;;  %v1282_v17 = vmul.f32 %v4467_v10, %v1058_v16  ;;  %v1523_v3 = vmul.f32 %v3034_v53, %v1486_v39 }
 0x1a0   : > { %v1060_v1 = vsel %vm996_vm4, %v964_v51, %v4468_v5  ;;  %v1508_v48 = vmul.f32 %v4462_v50, %v4470_v8  ;;  %v1506_v14 = vmul.f32 %v4471_v24, %v4357_v45  ;;  %v1298_v13 = vmul.f32 %v4472_v59, %v1074_v58 }
 0x1a1   : > { %v1569_v12 = vmul.f32 64.0, %v1537_v36  ;;  %v1284_v28 = vmul.f32 %v4469_v57, %v1060_v1  ;;  %v1076_v18 = vsel %vm1012_vm5, %v980_v0, %v4473_v32  ;;  %v1555_v21 = vadd.f32 %v1523_v3, %v1299_v15  ;;  %v1491_v15 = vpop.permute.xlu1 %1490  ;;  %v4475_v3 = vld [vmem:[#allocation75_spill] sm:$0xff] }
 0x1a2   : > { %v3903_v16 = vsel %vm1591_vm1, %v1582_v27, -1e+30  ;;  %v1585_v39 = vmul.f32 64.0, %v1553_v40  ;;  %v1538_v46 = vadd.f32 %v1506_v14, %v1282_v17  ;;  %v1522_v45 = vmul.f32 %v1481_v6, %v3076_v55 }
 0x1a3   : > { %1674 = vmax.xlane.f32.xlu0 %v3903_v16  ;;  %v3908_v53 = vsel %vm1591_vm1, %v1569_v12, -1e+30  ;;  %v1540_v60 = vadd.f32 %v1508_v48, %v1284_v28  ;;  %v1300_v34 = vmul.f32 %v4474_v56, %v1076_v18  ;;  %v1587_v40 = vmul.f32 64.0, %v1555_v21 }
 0x1a4   : > { %1648 = vmax.xlane.f32.xlu1 %v3908_v53  ;;  %v1554_v0 = vadd.f32 %v1522_v45, %v1298_v13  ;;  %v3915_v50 = vsel %vm1591_vm1, %v1585_v39, -1e+30  ;;  %v1570_v27 = vmul.f32 64.0, %v1538_v46  ;;  %v1524_v55 = vmul.f32 %v4466_v54, %v1491_v15 }
 0x1a5   : > { %v1572_v22 = vmul.f32 64.0, %v1540_v60  ;;  %v3926_v51 = vsel %vm1591_vm1, %v1587_v40, -1e+30 }
 0x1a6   : > { %v1556_v7 = vadd.f32 %v1524_v55, %v1300_v34  ;;  %v3930_v31 = vsel %vm1591_vm1, %v1570_v27, -1e+30  ;;  %v1586_v58 = vmul.f32 64.0, %v1554_v0 }
 0x1a7   : > { %v3919_v4 = vsel %vm1591_vm1, %v1572_v22, -1e+30 }
 0x1a8   : > { %1680 = vmax.xlane.f32.xlu1 %v3915_v50  ;;  %1654 = vmax.xlane.f32.xlu0 %v3919_v4  ;;  %v3936_v36 = vsel %vm1591_vm1, %v1586_v58, -1e+30  ;;  %v1588_v10 = vmul.f32 64.0, %v1556_v7 }
 0x1aa   : > { %v3941_v54 = vsel %vm1591_vm1, %v1588_v10, -1e+30 }
 0x1ac   : > { %1684 = vmax.xlane.f32.xlu1 %v3926_v51  ;;  %1650 = vmax.xlane.f32.xlu0 %v3930_v31 }
 0x1b0   : > { %1682 = vmax.xlane.f32.xlu0 %v3936_v36 }
 0x1b4   : > { %1686 = vmax.xlane.f32.xlu0 %v3941_v54 }
 0x1e3   : > { %v1661_v17 = vpop.xlane.xlu1 %1660 }
 0x1e4   : > { %v1706_v5 = vsub.f32 %v4475_v3, %v1661_v17 }
 0x1e6   : > { %v1756_v57 = vmul.f32 1.442695, %v1706_v5 }
 0x1f0   : > { %v1657_v28 = vpop.xlane.xlu1 %1656 }
 0x1f1   : > { %v1704_v8 = vsub.f32 %v3556_v26, %v1657_v28 }
 0x1f2   : > { %v1629_v6 = vpop.xlane.xlu0 %1628 }
 0x1f3   : > { %v1690_v1 = vsub.f32 %v3566_v49, %v1629_v6  ;;  %v1752_v59 = vmul.f32 1.442695, %v1704_v8 }
 0x1f5   : > { %v1724_v12 = vmul.f32 1.442695, %v1690_v1 }
 0x1f7   : > { %2297 = vpow2.f32 %v1724_v12 }
 0x1f8   : > { %2299 = vpow2.f32 %v1756_v57 }
 0x1ff   : > { %v1625_v48 = vpop.xlane.xlu0 %1624 }
 0x200   : > { %v1688_v11 = vsub.f32 %v3627_v20, %v1625_v48 }
 0x201   : > { %v3948_v24 = vpop.eup %2297 }
 0x202   : > { %v1720_v14 = vmul.f32 1.442695, %v1688_v11  ;;  %1788 = vadd.xlane.f32.xlu1 %v3948_v24  ;;  %v3952_v32 = vpop.eup %2299 }
 0x203   : > { %v1631_v13 = vpop.xlane.xlu0 %1630 }
 0x204   : > { %2301 = vpow2.f32 %v1720_v14  ;;  %v1691_v49 = vsub.f32 %v3646_v38, %v1631_v13 }
 0x205   : > { %v1627_v18 = vpop.xlane.xlu1 %1626  ;;  %2303 = vpow2.f32 %v1752_v59 }
 0x206   : > { %v1726_v21 = vmul.f32 1.442695, %v1691_v49  ;;  %1820 = vadd.xlane.f32.xlu1 %v3952_v32  ;;  %v1689_v20 = vsub.f32 %v3655_v23, %v1627_v18 }
 0x207   : > { %v1663_v26 = vpop.xlane.xlu0 %1662 }
 0x208   : > { %2305 = vpow2.f32 %v1726_v21  ;;  %v1707_v39 = vsub.f32 %v3659_v62, %v1663_v26  ;;  %v1722_v0 = vmul.f32 1.442695, %v1689_v20 }
 0x209   : > { %v1637_v60 = vpop.xlane.xlu1 %1636 }
 0x20a   : > { %v1758_v46 = vmul.f32 1.442695, %v1707_v39  ;;  %v1694_v45 = vsub.f32 %v3683_v19, %v1637_v60 }
 0x20b   : > { %v1659_v22 = vpop.xlane.xlu0 %1658 }
 0x20c   : > { %2307 = vpow2.f32 %v1758_v46  ;;  %v1732_v38 = vmul.f32 1.442695, %v1694_v45  ;;  %v1705_v15 = vsub.f32 %v3665_v29, %v1659_v22 }
 0x20d   : > { %v1669_v56 = vpop.xlane.xlu1 %1668 }
 0x20e   : > { %v3959_v34 = vpop.eup %2301  ;;  %2309 = vpow2.f32 %v1732_v38  ;;  %v1710_v40 = vsub.f32 %v3669_v37, %v1669_v56  ;;  %v1754_v23 = vmul.f32 1.442695, %v1705_v15 }
 0x20f   : > { %1784 = vadd.xlane.f32.xlu1 %v3959_v34  ;;  %2311 = vpow2.f32 %v1722_v0  ;;  %v3963_v27 = vpop.eup %2303 }
 0x210   : > { %v1764_v62 = vmul.f32 1.442695, %v1710_v40 }
 0x211   : > { %v1633_v19 = vpop.xlane.xlu1 %1632 }
 0x212   : > { %v3965_v55 = vpop.eup %2305  ;;  %2313 = vpow2.f32 %v1764_v62  ;;  %v1692_v7 = vsub.f32 %v3722_v35, %v1633_v19  ;;  %v1639_v29 = vpop.xlane.xlu0 %1638 }
 0x213   : > { %v1695_v58 = vsub.f32 %v3730_v47, %v1639_v29  ;;  %1790 = vadd.xlane.f32.xlu0 %v3965_v55  ;;  %1816 = vadd.xlane.f32.xlu1 %v3963_v27  ;;  %2315 = vpow2.f32 %v1754_v23 }
 0x214   : > { %v1728_v37 = vmul.f32 1.442695, %v1692_v7 }
 0x215   : > { %v1734_v10 = vmul.f32 1.442695, %v1695_v58  ;;  %v1665_v17 = vpop.xlane.xlu1 %1664 }
 0x216   : > { %v3971_v6 = vpop.eup %2307  ;;  %2317 = vpow2.f32 %v1728_v37  ;;  %v1708_v3 = vsub.f32 %v3708_v61, %v1665_v17  ;;  %v1671_v5 = vpop.xlane.xlu0 %1670 }
 0x217   : > { %v1711_v1 = vsub.f32 %v3757_v9, %v1671_v5  ;;  %1822 = vadd.xlane.f32.xlu0 %v3971_v6  ;;  %2319 = vpow2.f32 %v1734_v10 }
 0x218   : > { %v3976_v35 = vpop.eup %2309  ;;  %v1760_v47 = vmul.f32 1.442695, %v1708_v3 }
 0x219   : > { %v1766_v12 = vmul.f32 1.442695, %v1711_v1  ;;  %1796 = vadd.xlane.f32.xlu1 %v3976_v35  ;;  %v3979_v57 = vpop.eup %2311 }
 0x21a   : > { %2321 = vpow2.f32 %v1760_v47  ;;  %v1635_v28 = vpop.xlane.xlu0 %1634  ;;  %v1645_v8 = vpop.xlane.xlu1 %1644 }
 0x21b   : > { %v1693_v48 = vsub.f32 %v3774_v52, %v1635_v28  ;;  %v1698_v61 = vsub.f32 %v3782_v63, %v1645_v8  ;;  %1786 = vadd.xlane.f32.xlu0 %v3979_v57  ;;  %2323 = vpow2.f32 %v1766_v12 }
 0x21c   : > { %v3984_v9 = vpop.eup %2313 }
 0x21d   : > { %v1730_v11 = vmul.f32 1.442695, %v1693_v48  ;;  %v1740_v14 = vmul.f32 1.442695, %v1698_v61  ;;  %1828 = vadd.xlane.f32.xlu1 %v3984_v9  ;;  %v3987_v59 = vpop.eup %2315 }
 0x21e   : > { %v1667_v13 = vpop.xlane.xlu0 %1666  ;;  %v1677_v49 = vpop.xlane.xlu1 %1676 }
 0x21f   : > { %2325 = vpow2.f32 %v1730_v11  ;;  %v1709_v18 = vsub.f32 %v3762_v43, %v1667_v13  ;;  %v1714_v52 = vsub.f32 %v3766_v30, %v1677_v49  ;;  %1818 = vadd.xlane.f32.xlu0 %v3987_v59 }
 0x220   : > { %v3992_v63 = vpop.eup %2317  ;;  %2327 = vpow2.f32 %v1740_v14 }
 0x221   : > { %v1762_v21 = vmul.f32 1.442695, %v1709_v18  ;;  %v1772_v26 = vmul.f32 1.442695, %v1714_v52  ;;  %1792 = vadd.xlane.f32.xlu1 %v3992_v63  ;;  %v3995_v20 = vpop.eup %2319 }
 0x222   : > { %v1641_v39 = vpop.xlane.xlu1 %1640 }
 0x223   : > { %2329 = vpow2.f32 %v1762_v21  ;;  %v1696_v60 = vsub.f32 %v3815_v41, %v1641_v39  ;;  %1798 = vadd.xlane.f32.xlu0 %v3995_v20 }
 0x224   : > { %v1647_v46 = vpop.xlane.xlu0 %1646  ;;  %v3999_v43 = vpop.eup %2321  ;;  %2331 = vpow2.f32 %v1772_v26 }
 0x225   : > { %v1699_v30 = vsub.f32 %v3826_v2, %v1647_v46  ;;  %v1736_v45 = vmul.f32 1.442695, %v1696_v60  ;;  %1824 = vadd.xlane.f32.xlu1 %v3999_v43  ;;  %v4003_v22 = vpop.eup %2323 }
 0x226   : > { %v1673_v38 = vpop.xlane.xlu1 %1672 }
 0x227   : > { %v1742_v0 = vmul.f32 1.442695, %v1699_v30  ;;  %2333 = vpow2.f32 %v1736_v45  ;;  %v1712_v15 = vsub.f32 %v3830_v33, %v1673_v38  ;;  %1830 = vadd.xlane.f32.xlu0 %v4003_v22 }
 0x228   : > { %v1679_v56 = vpop.xlane.xlu0 %1678 }
 0x229   : > { %2335 = vpow2.f32 %v1742_v0  ;;  %v1715_v41 = vsub.f32 %v3852_v25, %v1679_v56  ;;  %v4008_v40 = vpop.eup %2325  ;;  %v1768_v23 = vmul.f32 1.442695, %v1712_v15 }
 0x22a   : > { %v4010_v2 = vpop.eup %2327 }
 0x22b   : > { %v1774_v62 = vmul.f32 1.442695, %v1715_v41  ;;  %2337 = vpow2.f32 %v1768_v23  ;;  %1804 = vadd.xlane.f32.xlu1 %v4010_v2  ;;  %1794 = vadd.xlane.f32.xlu0 %v4008_v40 }
 0x22c   : > { %v1643_v19 = vpop.xlane.xlu0 %1642  ;;  %v1653_v7 = vpop.xlane.xlu1 %1652 }
 0x22d   : > { %2339 = vpow2.f32 %v1774_v62  ;;  %v1697_v33 = vsub.f32 %v3877_v44, %v1643_v19  ;;  %v1702_v29 = vsub.f32 %v3881_v42, %v1653_v7  ;;  %v4016_v58 = vpop.eup %2329 }
 0x22e   : > { %v4018_v25 = vpop.eup %2331 }
 0x22f   : > { %v1738_v37 = vmul.f32 1.442695, %v1697_v33  ;;  %v1748_v10 = vmul.f32 1.442695, %v1702_v29  ;;  %1836 = vadd.xlane.f32.xlu1 %v4018_v25  ;;  %1826 = vadd.xlane.f32.xlu0 %v4016_v58 }
 0x230   : > { %v1675_v17 = vpop.xlane.xlu0 %1674 }
 0x231   : > { %2341 = vpow2.f32 %v1738_v37  ;;  %v1713_v3 = vsub.f32 %v3903_v16, %v1675_v17  ;;  %v1649_v5 = vpop.xlane.xlu1 %1648  ;;  %v4023_v1 = vpop.eup %2333 }
 0x232   : > { %2343 = vpow2.f32 %v1748_v10  ;;  %v1700_v44 = vsub.f32 %v3908_v53, %v1649_v5 }
 0x233   : > { %v4026_v42 = vpop.eup %2335  ;;  %v1770_v47 = vmul.f32 1.442695, %v1713_v3  ;;  %1800 = vadd.xlane.f32.xlu1 %v4023_v1 }
 0x234   : > { %v1744_v12 = vmul.f32 1.442695, %v1700_v44  ;;  %1806 = vadd.xlane.f32.xlu0 %v4026_v42 }
 0x235   : > { %2345 = vpow2.f32 %v1770_v47  ;;  %v1681_v28 = vpop.xlane.xlu1 %1680  ;;  %v1655_v8 = vpop.xlane.xlu0 %1654 }
 0x236   : > { %v4030_v48 = vpop.eup %2337  ;;  %2347 = vpow2.f32 %v1744_v12  ;;  %v1716_v16 = vsub.f32 %v3915_v50, %v1681_v28  ;;  %v1703_v61 = vsub.f32 %v3919_v4, %v1655_v8 }
 0x237   : > { %v4034_v11 = vpop.eup %2339  ;;  %1832 = vadd.xlane.f32.xlu1 %v4030_v48 }
 0x238   : > { %v1776_v53 = vmul.f32 1.442695, %v1716_v16  ;;  %v1750_v14 = vmul.f32 1.442695, %v1703_v61  ;;  %1838 = vadd.xlane.f32.xlu0 %v4034_v11 }
 0x239   : > { %v1685_v13 = vpop.xlane.xlu1 %1684  ;;  %v1651_v49 = vpop.xlane.xlu0 %1650 }
 0x23a   : > { %2349 = vpow2.f32 %v1776_v53  ;;  %v1718_v18 = vsub.f32 %v3926_v51, %v1685_v13  ;;  %v1701_v52 = vsub.f32 %v3930_v31, %v1651_v49 }
 0x23b   : > { %v4040_v21 = vpop.eup %2341  ;;  %2351 = vpow2.f32 %v1750_v14 }
 0x23c   : > { %v4042_v50 = vpop.eup %2343  ;;  %v1780_v4 = vmul.f32 1.442695, %v1718_v18  ;;  %v1746_v26 = vmul.f32 1.442695, %v1701_v52  ;;  %1802 = vadd.xlane.f32.xlu0 %v4040_v21 }
 0x23d   : > { %v1683_v39 = vpop.xlane.xlu0 %1682  ;;  %1812 = vadd.xlane.f32.xlu1 %v4042_v50 }
 0x23e   : > { %2353 = vpow2.f32 %v1780_v4  ;;  %v1717_v60 = vsub.f32 %v3936_v36, %v1683_v39 }
 0x23f   : > { %v4047_v46 = vpop.eup %2345  ;;  %2355 = vpow2.f32 %v1746_v26 }
 0x240   : > { %v4049_v51 = vpop.eup %2347  ;;  %v1778_v31 = vmul.f32 1.442695, %v1717_v60  ;;  %1834 = vadd.xlane.f32.xlu0 %v4047_v46 }
 0x241   : > { %v1687_v30 = vpop.xlane.xlu0 %1686  ;;  %1808 = vadd.xlane.f32.xlu1 %v4049_v51 }
 0x242   : > { %v1719_v45 = vsub.f32 %v3941_v54, %v1687_v30  ;;  %2357 = vpow2.f32 %v1778_v31 }
 0x244   : > { %v4054_v0 = vpop.eup %2349  ;;  %v1782_v38 = vmul.f32 1.442695, %v1719_v45 }
 0x245   : > { %v4056_v15 = vpop.eup %2351  ;;  %1840 = vadd.xlane.f32.xlu1 %v4054_v0 }
 0x246   : > { %1814 = vadd.xlane.f32.xlu0 %v4056_v15  ;;  %2359 = vpow2.f32 %v1782_v38 }
 0x248   : > { %v4060_v36 = vpop.eup %2353 }
 0x249   : > { %v4062_v56 = vpop.eup %2355  ;;  %1844 = vadd.xlane.f32.xlu1 %v4060_v36 }
 0x24a   : > { %1810 = vadd.xlane.f32.xlu0 %v4062_v56 }
 0x24c   : > { %v4066_v54 = vpop.eup %2357 }
 0x24e   : > { %1842 = vadd.xlane.f32.xlu0 %v4066_v54 }
 0x250   : > { %v4069_v41 = vpop.eup %2359 }
 0x252   : > { %1846 = vadd.xlane.f32.xlu0 %v4069_v41 }
 0x28f   : > { %v1789_v23 = vpop.xlane.xlu1 %1788 }
 0x290   : > { %2361 = vrcp.f32 %v1789_v23 }
 0x293   : > { %v1821_v62 = vpop.xlane.xlu1 %1820 }
 0x294   : > { %2363 = vrcp.f32 %v1821_v62 }
 0x29a   : > { %v2362_v19 = vpop.eup %2361 }
 0x29b   : > { %v1882_v7 = vmul.f32 %v2362_v19, %v3948_v24 }
 0x29c   : > { %v1785_v33 = vpop.xlane.xlu1 %1784 }
 0x29d   : > { %1914 = vst [vmem:[%s4076_s17 + $0x10] sm:$0xff] %v1882_v7  ;;  %2365 = vrcp.f32 %v1785_v33 }
 0x29e   : > { %v2364_v29 = vpop.eup %2363 }
 0x29f   : > { %v1898_v37 = vmul.f32 %v2364_v29, %v3952_v32 }
 0x2a0   : > { %v1791_v10 = vpop.xlane.xlu0 %1790  ;;  %v1817_v17 = vpop.xlane.xlu1 %1816 }
 0x2a1   : > { %1930 = vst [vmem:[%s4076_s17 + $0x90] sm:$0xff] %v1898_v37  ;;  %2367 = vrcp.f32 %v1791_v10 }
 0x2a2   : > { %2369 = vrcp.f32 %v1817_v17 }
 0x2a4   : > { %v1823_v3 = vpop.xlane.xlu0 %1822 }
 0x2a5   : > { %2371 = vrcp.f32 %v1823_v3 }
 0x2a6   : > { %v1797_v24 = vpop.xlane.xlu1 %1796 }
 0x2a7   : > { %v2366_v5 = vpop.eup %2365  ;;  %2373 = vrcp.f32 %v1797_v24 }
 0x2a8   : > { %v1880_v44 = vmul.f32 %v2366_v5, %v3959_v34  ;;  %v1787_v47 = vpop.xlane.xlu0 %1786 }
 0x2a9   : > { %2375 = vrcp.f32 %v1787_v47 }
 0x2aa   : > { %1912 = vst [vmem:[%s4076_s17] sm:$0xff] %v1880_v44  ;;  %v1829_v12 = vpop.xlane.xlu1 %1828 }
 0x2ab   : > { %v2368_v28 = vpop.eup %2367  ;;  %2377 = vrcp.f32 %v1829_v12 }
 0x2ac   : > { %v2370_v32 = vpop.eup %2369  ;;  %v1883_v8 = vmul.f32 %v2368_v28, %v3965_v55  ;;  %v1819_v16 = vpop.xlane.xlu0 %1818 }
 0x2ad   : > { %v1896_v61 = vmul.f32 %v2370_v32, %v3963_v27  ;;  %2379 = vrcp.f32 %v1819_v16 }
 0x2ae   : > { %1915 = vst [vmem:[%s4076_s17 + $0x18] sm:$0xff] %v1883_v8  ;;  %v1793_v53 = vpop.xlane.xlu1 %1792 }
 0x2af   : > { %v2372_v14 = vpop.eup %2371  ;;  %1928 = vst [vmem:[%s4076_s17 + $0x80] sm:$0xff] %v1896_v61  ;;  %2381 = vrcp.f32 %v1793_v53 }
 0x2b0   : > { %v1899_v34 = vmul.f32 %v2372_v14, %v3971_v6  ;;  %v1799_v13 = vpop.xlane.xlu0 %1798 }
 0x2b1   : > { %v2374_v49 = vpop.eup %2373  ;;  %2383 = vrcp.f32 %v1799_v13 }
 0x2b2   : > { %1931 = vst [vmem:[%s4076_s17 + $0x98] sm:$0xff] %v1899_v34  ;;  %v1886_v55 = vmul.f32 %v2374_v49, %v3976_v35  ;;  %v1825_v18 = vpop.xlane.xlu1 %1824 }
 0x2b3   : > { %v2376_v52 = vpop.eup %2375  ;;  %2385 = vrcp.f32 %v1825_v18 }
 0x2b4   : > { %1918 = vst [vmem:[%s4076_s17 + $0x30] sm:$0xff] %v1886_v55  ;;  %v1881_v27 = vmul.f32 %v2376_v52, %v3979_v57  ;;  %v1831_v4 = vpop.xlane.xlu0 %1830 }
 0x2b5   : > { %v2378_v26 = vpop.eup %2377  ;;  %2387 = vrcp.f32 %v1831_v4 }
 0x2b6   : > { %1913 = vst [vmem:[%s4076_s17 + $0x8] sm:$0xff] %v1881_v27  ;;  %v1902_v6 = vmul.f32 %v2378_v26, %v3984_v9 }
 0x2b7   : > { %v2380_v39 = vpop.eup %2379 }
 0x2b8   : > { %1934 = vst [vmem:[%s4076_s17 + $0xb0] sm:$0xff] %v1902_v6  ;;  %v1897_v60 = vmul.f32 %v2380_v39, %v3987_v59  ;;  %v1805_v35 = vpop.xlane.xlu1 %1804  ;;  %v1795_v31 = vpop.xlane.xlu0 %1794 }
 0x2b9   : > { %v2382_v30 = vpop.eup %2381  ;;  %2389 = vrcp.f32 %v1805_v35 }
 0x2ba   : > { %1929 = vst [vmem:[%s4076_s17 + $0x88] sm:$0xff] %v1897_v60  ;;  %v1884_v57 = vmul.f32 %v2382_v30, %v3992_v63  ;;  %2391 = vrcp.f32 %v1795_v31 }
 0x2bb   : > { %v2384_v45 = vpop.eup %2383 }
 0x2bc   : > { %1916 = vst [vmem:[%s4076_s17 + $0x20] sm:$0xff] %v1884_v57  ;;  %v1887_v38 = vmul.f32 %v2384_v45, %v3995_v20  ;;  %v1837_v9 = vpop.xlane.xlu1 %1836  ;;  %v1827_v23 = vpop.xlane.xlu0 %1826 }
 0x2bd   : > { %v2386_v62 = vpop.eup %2385  ;;  %2393 = vrcp.f32 %v1837_v9 }
 0x2be   : > { %1919 = vst [vmem:[%s4076_s17 + $0x38] sm:$0xff] %v1887_v38  ;;  %v1900_v59 = vmul.f32 %v2386_v62, %v3999_v43  ;;  %2395 = vrcp.f32 %v1827_v23 }
 0x2bf   : > { %v2388_v19 = vpop.eup %2387 }
 0x2c0   : > { %1932 = vst [vmem:[%s4076_s17 + $0xa0] sm:$0xff] %v1900_v59  ;;  %v1903_v7 = vmul.f32 %v2388_v19, %v4003_v22  ;;  %v1801_v63 = vpop.xlane.xlu1 %1800 }
 0x2c1   : > { %v1807_v33 = vpop.xlane.xlu0 %1806  ;;  %2397 = vrcp.f32 %v1801_v63 }
 0x2c2   : > { %1935 = vst [vmem:[%s4076_s17 + $0xb8] sm:$0xff] %v1903_v7  ;;  %2399 = vrcp.f32 %v1807_v33 }
 0x2c3   : > { %v2390_v20 = vpop.eup %2389 }
 0x2c4   : > { %v2392_v29 = vpop.eup %2391  ;;  %v1890_v37 = vmul.f32 %v2390_v20, %v4010_v2  ;;  %v1833_v10 = vpop.xlane.xlu1 %1832 }
 0x2c5   : > { %v1839_v17 = vpop.xlane.xlu0 %1838  ;;  %v1885_v43 = vmul.f32 %v2392_v29, %v4008_v40  ;;  %2401 = vrcp.f32 %v1833_v10 }
 0x2c6   : > { %1922 = vst [vmem:[%s4076_s17 + $0x50] sm:$0xff] %v1890_v37  ;;  %2403 = vrcp.f32 %v1839_v17 }
 0x2c7   : > { %v2394_v22 = vpop.eup %2393  ;;  %1917 = vst [vmem:[%s4076_s17 + $0x28] sm:$0xff] %v1885_v43 }
 0x2c8   : > { %v2396_v3 = vpop.eup %2395  ;;  %v1906_v24 = vmul.f32 %v2394_v22, %v4018_v25 }
 0x2c9   : > { %v1803_v5 = vpop.xlane.xlu0 %1802  ;;  %v1901_v44 = vmul.f32 %v2396_v3, %v4016_v58 }
 0x2ca   : > { %v1813_v47 = vpop.xlane.xlu1 %1812  ;;  %2405 = vrcp.f32 %v1803_v5  ;;  %1938 = vst [vmem:[%s4076_s17 + $0xd0] sm:$0xff] %v1906_v24 }
 0x2cb   : > { %2407 = vrcp.f32 %v1813_v47  ;;  %v2398_v2 = vpop.eup %2397  ;;  %1933 = vst [vmem:[%s4076_s17 + $0xa8] sm:$0xff] %v1901_v44 }
 0x2cc   : > { %v2400_v40 = vpop.eup %2399  ;;  %v1888_v12 = vmul.f32 %v2398_v2, %v4023_v1 }
 0x2cd   : > { %v1835_v28 = vpop.xlane.xlu0 %1834  ;;  %v1891_v32 = vmul.f32 %v2400_v40, %v4026_v42 }
 0x2ce   : > { %v1809_v8 = vpop.xlane.xlu1 %1808  ;;  %2409 = vrcp.f32 %v1835_v28  ;;  %1920 = vst [vmem:[%s4076_s17 + $0x40] sm:$0xff] %v1888_v12 }
 0x2cf   : > { %2411 = vrcp.f32 %v1809_v8  ;;  %v2402_v58 = vpop.eup %2401  ;;  %1923 = vst [vmem:[%s4076_s17 + $0x58] sm:$0xff] %v1891_v32 }
 0x2d0   : > { %v2404_v25 = vpop.eup %2403  ;;  %v1904_v16 = vmul.f32 %v2402_v58, %v4030_v48 }
 0x2d1   : > { %v1907_v61 = vmul.f32 %v2404_v25, %v4034_v11 }
 0x2d2   : > { %v1841_v53 = vpop.xlane.xlu1 %1840  ;;  %1936 = vst [vmem:[%s4076_s17 + $0xc0] sm:$0xff] %v1904_v16 }
 0x2d3   : > { %2413 = vrcp.f32 %v1841_v53  ;;  %v1815_v1 = vpop.xlane.xlu0 %1814  ;;  %1939 = vst [vmem:[%s4076_s17 + $0xd8] sm:$0xff] %v1907_v61 }
 0x2d4   : > { %v2406_v14 = vpop.eup %2405  ;;  %2415 = vrcp.f32 %v1815_v1 }
 0x2d5   : > { %v2408_v42 = vpop.eup %2407  ;;  %v1889_v34 = vmul.f32 %v2406_v14, %v4040_v21 }
 0x2d6   : > { %v1894_v13 = vmul.f32 %v2408_v42, %v4042_v50  ;;  %v1845_v49 = vpop.xlane.xlu1 %1844 }
 0x2d7   : > { %1921 = vst [vmem:[%s4076_s17 + $0x48] sm:$0xff] %v1889_v34  ;;  %2417 = vrcp.f32 %v1845_v49  ;;  %v1811_v48 = vpop.xlane.xlu0 %1810 }
 0x2d8   : > { %v2410_v11 = vpop.eup %2409  ;;  %1926 = vst [vmem:[%s4076_s17 + $0x70] sm:$0xff] %v1894_v13  ;;  %2419 = vrcp.f32 %v1811_v48 }
 0x2d9   : > { %v2412_v55 = vpop.eup %2411  ;;  %v1905_v18 = vmul.f32 %v2410_v11, %v4047_v46 }
 0x2da   : > { %v1892_v52 = vmul.f32 %v2412_v55, %v4049_v51 }
 0x2db   : > { %1937 = vst [vmem:[%s4076_s17 + $0xc8] sm:$0xff] %v1905_v18  ;;  %v1843_v27 = vpop.xlane.xlu0 %1842 }
 0x2dc   : > { %1924 = vst [vmem:[%s4076_s17 + $0x60] sm:$0xff] %v1892_v52  ;;  %2421 = vrcp.f32 %v1843_v27 }
 0x2dd   : > { %v2414_v21 = vpop.eup %2413 }
 0x2de   : > { %v2416_v50 = vpop.eup %2415  ;;  %v1908_v4 = vmul.f32 %v2414_v21, %v4054_v0 }
 0x2df   : > { %v1895_v26 = vmul.f32 %v2416_v50, %v4056_v15  ;;  %v1847_v6 = vpop.xlane.xlu0 %1846 }
 0x2e0   : > { %1940 = vst [vmem:[%s4076_s17 + $0xe0] sm:$0xff] %v1908_v4  ;;  %2423 = vrcp.f32 %v1847_v6 }
 0x2e1   : > { %v2418_v46 = vpop.eup %2417  ;;  %1927 = vst [vmem:[%s4076_s17 + $0x78] sm:$0xff] %v1895_v26 }
 0x2e2   : > { %v2420_v51 = vpop.eup %2419  ;;  %v1910_v39 = vmul.f32 %v2418_v46, %v4060_v36 }
 0x2e3   : > { %v1893_v60 = vmul.f32 %v2420_v51, %v4062_v56 }
 0x2e4   : > { %1942 = vst [vmem:[%s4076_s17 + $0xf0] sm:$0xff] %v1910_v39 }
 0x2e5   : > { %1925 = vst [vmem:[%s4076_s17 + $0x68] sm:$0xff] %v1893_v60 }
 0x2e6   : > { %v2422_v35 = vpop.eup %2421 }
 0x2e7   : > { %v1909_v0 = vmul.f32 %v2422_v35, %v4066_v54 }
 0x2e9   : > { %1941 = vst [vmem:[%s4076_s17 + $0xe8] sm:$0xff] %v1909_v0 }
 0x2ea   : > { %v2424_v15 = vpop.eup %2423 }
 0x2eb   : > { %v1911_v36 = vmul.f32 %v2424_v15, %v4069_v41 }
 0x2ed   : > { %1943 = vst [vmem:[%s4076_s17 + $0xf8] sm:$0xff] %v1911_v36 }
 0x2ee   : > { %2438 = shalt.err (!%p2435_p3)
}
 0x2ef   : > { %s2439_s4 = scalar_lea.hbm %s4144_s26, 4096  ;;  %s2443_s7 = scalar_lea.hbm %s4196_s3, 8192 }
 0x2f0   : > { %p2440_p4 = scmp.ne.s32.totalorder %s4144_s26, %s2439_s4  ;;  %p2444_p9 = scmp.lt.u32.totalorder %s4144_s26, %s4196_s3 }
 0x2f1   : > { %p2445_p10 = scmp.lt.u32.totalorder %s2443_s7, %s2439_s4  ;;  %p2447_p12 = scmp.lt.u32.totalorder %s2439_s4, %s4144_s26 }
 0x2f2   : > { %p2441_p7 = pnand %p2440_p4, %p2551_p5 }
 0x2f3   : > { %p2446_p11 = por %p2445_p10, %p2444_p9 }
 0x2f4   : > { %p2442_p8 = pneg %p2441_p7 }
 0x2f5   : > { %p2448_p13 = por %p2447_p12, %p2446_p11 }
 0x2f7   : > { %p2449_p0 = pnand %p2448_p13, %p2442_p8 }
 0x2f9   : > { %2452 = shalt.err (!%p2449_p0)
}
 0x2fa   : > { %s2491_s10 = smov 128   ;;  %s2492_s11 = smov 8  }
 0x2fb   : > { %2171 = dma.vmem_to_hbm [thread:$0]  (%p2551_p5), %s4146_s20, 4096, %s4144_s26, %s4152_s27, %s2491_s10, %s2491_s10, %s2492_s11  }
 0x2fc PF: > { %p2177_p1 = scmp.ge.s32.totalorder %s2487_s15, 2  ;;  %s1973_s17 = sand.u32 1, %s2475_s12  }
 0x2fd   : > { %s1974_s19 = scalar_lea.sflag [#allocation3], %s1973_s17 }
 0x2fe   : > { %p2174_p2 = pnand %p2177_p1, %p2555_p6 }
 0x300   : > { %2470 = dma.done.wait (!%p2174_p2), %s1974_s19, 4096  }
 0x301   : > { %2472 = vsyncadd (!%p2174_p2), %s1974_s19, 4294963200  ;;  %p13_p3 = scmp.ge.s32.totalorder %s2538_s18, 4   ;;  %s4476_s12 = smov %s2479_s13 }
 0x302   : > { %s4477_s13 = smov %s2483_s14  ;;  %s4478_s14 = smov %s2549_s21 }
 0x303   : > { %s4479_s15 = smov %s2538_s18  ;;  %15 = sbr.rel (!%p13_p3) target bundleno = 3 (0x3), region = 70 }
 0x30a   :  { %1979 = vsyncpa [#allocation3], 1 }
 0x30b   :  { %1981 = vsyncpa [#allocation3 + $0x1], 1 }

</bundles_post_ra>
